<compile_context>
chip_gen: v6e
topology: v6e:2x2x1
jax: 0.10.0
libtpu: 0.0.40
codegen_flags: <defaults>
</compile_context>

<pallas_src>
import functools

import jax
import jax.numpy as jnp
from jax.experimental import pallas as pl
from jax.experimental.pallas import tpu as pltpu  # noqa: F401  (kept for parity)

HID_DIM = 32
N_HEADS = 4
HEAD_DIM = HID_DIM // N_HEADS
PF_DIM = 64
PF_PAD = 128          # FFN hidden zero-padded to a full lane width / MXU depth
LN_EPS = 1e-5

# rows of the packed bias / LayerNorm slab (shape (13, 128), zero-padded rows)
(ROW_B_SA_QKV, ROW_B_SA_O, ROW_B_EA_Q, ROW_B_EA_KV, ROW_B_EA_O,
 ROW_B_FF1, ROW_B_FF2,
 ROW_LN1_G, ROW_LN1_B, ROW_LN2_G, ROW_LN2_B, ROW_LN3_G, ROW_LN3_B) = range(13)
BLN_ROWS = 13
BLN_WIDTH = 128


# ----------------------------- the Pallas kernel ----------------------------


def decoder_layer_kernel(trg_ref, enc_ref,
                         w_self_ref, w_enc_ref, w_ff1_ref, w_ff2_ref, bln_ref,
                         out_ref, attn_ref, *, B, S, Ss):
    H, NH, D = HID_DIM, N_HEADS, HEAD_DIM
    inv_scale = 1.0 / (float(D) ** 0.5)

    trg = trg_ref[...]   # (B*S,  H) f32, rows are (b, s) b-major
    enc = enc_ref[...]   # (B*Ss, H) f32

    def dot(a, w):
        # bf16 operands (weights are already bf16), f32 accumulation on MXU.
        return jnp.dot(a.astype(jnp.bfloat16), w,
                       preferred_element_type=jnp.float32)

    def bias(row, width):
        return bln_ref[row:row + 1, 0:width]          # (1, width) f32

    def layer_norm(x, g_row, b_row):
        g = bias(g_row, H)
        b = bias(b_row, H)
        mean = jnp.mean(x, axis=-1, keepdims=True)
        var = jnp.mean(jnp.square(x - mean), axis=-1, keepdims=True)
        return (x - mean) * jax.lax.rsqrt(var + LN_EPS) * g + b

    def batch_split(x2d, rows):
        # (B*rows, W) -> (B, rows, W).  A free reshape when `rows` is sublane
        # aligned; otherwise B (tiny) sublane slices stacked on a leading axis.
        if rows % 8 == 0:
            return x2d.reshape(B, rows, x2d.shape[-1])
        return jnp.stack([x2d[b * rows:(b + 1) * rows, :] for b in range(B)],
                         axis=0)

    def attention(q3, kv3, q_off, k_off, v_off):
        # q3: (B, S, *); kv3: (B, Skv, *).  Heads are D-wide lane slices taken
        # at the given column offsets; batch rides the einsum batch dim (no
        # per-(b,h) Python loop, no VMEM scratch round trip).
        Skv = kv3.shape[1]
        q3 = q3.astype(jnp.bfloat16)
        kv3 = kv3.astype(jnp.bfloat16)
        energy = jnp.stack(
            [jnp.einsum('bqd,bkd->bqk',
                        q3[..., q_off + h * D:q_off + (h + 1) * D],
                        kv3[..., k_off + h * D:k_off + (h + 1) * D],
                        preferred_element_type=jnp.float32)
             for h in range(NH)],
            axis=1) * inv_scale                               # (B, NH, S, Skv)
        # NOTE: masks intentionally NOT applied (reference discards masked_fill).
        m = jnp.max(energy, axis=-1, keepdims=True)
        e = jnp.exp(energy - m)
        attn = e / jnp.sum(e, axis=-1, keepdims=True)         # exact softmax
        attn_b = attn.astype(jnp.bfloat16)
        ctx = jnp.concatenate(
            [jnp.einsum('bqk,bkd->bqd',
                        attn_b[:, h],
                        kv3[..., v_off + h * D:v_off + (h + 1) * D],
                        preferred_element_type=jnp.float32)
             for h in range(NH)],
            axis=-1)                                          # (B, S, H)
        return ctx.reshape(B * S, H), attn

    # ---- self-attention + add & norm (dropout == identity) -----------------
    qkv = dot(trg, w_self_ref[:, 0:3 * H]) + bias(ROW_B_SA_QKV, 3 * H)  # (B*S,3H)
    qkv3 = batch_split(qkv, S)                                          # aligned
    ctx, _ = attention(qkv3, qkv3, 0, H, 2 * H)
    sa = dot(ctx, w_self_ref[:, 3 * H:4 * H]) + bias(ROW_B_SA_O, H)
    trg1 = layer_norm(trg + sa, ROW_LN1_G, ROW_LN1_B)

    # ---- encoder attention + add & norm -------------------------------------
    q = dot(trg1, w_enc_ref[:, 0:H]) + bias(ROW_B_EA_Q, H)              # (B*S, H)
    kv = dot(enc, w_enc_ref[:, H:3 * H]) + bias(ROW_B_EA_KV, 2 * H)     # (B*Ss,2H)
    ctx, attn = attention(batch_split(q, S), batch_split(kv, Ss), 0, 0, H)
    ea = dot(ctx, w_enc_ref[:, 3 * H:4 * H]) + bias(ROW_B_EA_O, H)
    trg2 = layer_norm(trg1 + ea, ROW_LN2_G, ROW_LN2_B)

    # ---- position-wise feed-forward + add & norm ----------------------------
    hidden = jnp.maximum(dot(trg2, w_ff1_ref[...]) + bias(ROW_B_FF1, PF_PAD), 0.0)
    ff = dot(hidden, w_ff2_ref[...]) + bias(ROW_B_FF2, H)
    trg3 = layer_norm(trg2 + ff, ROW_LN3_G, ROW_LN3_B)

    # ---- stores --------------------------------------------------------------
    out_ref[...] = trg3                                   # (B*S, H)
    attn_ref[...] = attn                                  # (B, NH, S, Ss)


# --------------------------------- wrapper -----------------------------------


def decoder_layer(trg, enc_src, trg_mask, src_mask, params):
    # Masks accepted for API parity but unused: the reference's masked_fill
    # result is discarded, so masking has no effect on the output.
    del trg_mask, src_mask
    B, S, H = trg.shape
    _, Ss, _ = enc_src.shape
    assert H == HID_DIM

    w_self, w_enc, w_ff1, w_ff2, bln = params

    trg2d = trg.reshape(B * S, H)
    enc2d = enc_src.reshape(B * Ss, H)

    kernel = functools.partial(decoder_layer_kernel, B=B, S=S, Ss=Ss)

    out2d, attn = pl.pallas_call(
        kernel,
        out_shape=(
            jax.ShapeDtypeStruct((B * S, H), jnp.float32),
            jax.ShapeDtypeStruct((B, N_HEADS, S, Ss), jnp.float32),
        ),
    )(trg2d, enc2d, w_self, w_enc, w_ff1, w_ff2, bln)

    return out2d.reshape(B, S, H), attn


# ------------------------ deterministic parameter init -----------------------


def init_params(key):
    ks = iter(jax.random.split(key, 64))

    def w(din, dout):
        return jax.random.normal(next(ks), (din, dout), jnp.float32) * 0.05

    def b(dout):
        return jax.random.normal(next(ks), (dout,), jnp.float32) * 0.05

    def ln():
        g = jnp.ones((HID_DIM,), jnp.float32) \
            + jax.random.normal(next(ks), (HID_DIM,), jnp.float32) * 0.01
        bb = jax.random.normal(next(ks), (HID_DIM,), jnp.float32) * 0.01
        return g, bb

    def pad_row(v):
        return jnp.pad(v, (0, BLN_WIDTH - v.shape[0]))

    H = HID_DIM
    # self-attention
    wq1, wk1, wv1, wo1 = w(H, H), w(H, H), w(H, H), w(H, H)
    bq1, bk1, bv1, bo1 = b(H), b(H), b(H), b(H)
    ln1_g, ln1_b = ln()
    # encoder attention
    wq2, wk2, wv2, wo2 = w(H, H), w(H, H), w(H, H), w(H, H)
    bq2, bk2, bv2, bo2 = b(H), b(H), b(H), b(H)
    ln2_g, ln2_b = ln()
    # feed-forward
    wf1, bf1 = w(H, PF_DIM), b(PF_DIM)
    wf2, bf2 = w(PF_DIM, H), b(H)
    ln3_g, ln3_b = ln()

    # packed slabs; weights pre-cast to bf16 (halves HBM->VMEM DMA bytes and
    # removes per-call f32->bf16 weight conversion inside the kernel).
    w_self = jnp.concatenate([wq1, wk1, wv1, wo1], axis=1).astype(jnp.bfloat16)
    w_enc = jnp.concatenate([wq2, wk2, wv2, wo2], axis=1).astype(jnp.bfloat16)
    # FFN hidden zero-padded 64 -> 128: lane-dense activations, full MXU depth;
    # relu(0)=0 and zero rows in w_ff2 keep the math identical.
    w_ff1 = jnp.pad(wf1, ((0, 0), (0, PF_PAD - PF_DIM))).astype(jnp.bfloat16)
    w_ff2 = jnp.pad(wf2, ((0, PF_PAD - PF_DIM), (0, 0))).astype(jnp.bfloat16)

    bln = jnp.stack([
        pad_row(jnp.concatenate([bq1, bk1, bv1])),  # ROW_B_SA_QKV
        pad_row(bo1),                               # ROW_B_SA_O
        pad_row(bq2),                               # ROW_B_EA_Q
        pad_row(jnp.concatenate([bk2, bv2])),       # ROW_B_EA_KV
        pad_row(bo2),                               # ROW_B_EA_O
        pad_row(bf1),                               # ROW_B_FF1 (zeros past 64)
        pad_row(bf2),                               # ROW_B_FF2
        pad_row(ln1_g), pad_row(ln1_b),
        pad_row(ln2_g), pad_row(ln2_b),
        pad_row(ln3_g), pad_row(ln3_b),
    ], axis=0)                                      # (13, 128) f32

    return (w_self, w_enc, w_ff1, w_ff2, bln)


if __name__ == "__main__":
    key = jax.random.PRNGKey(0)
    k_p, k_t, k_e = jax.random.split(key, 3)

    B, TRG_LEN, SRC_LEN = 2, 8, 12
    params = init_params(k_p)
    trg = jax.random.normal(k_t, (B, TRG_LEN, HID_DIM), jnp.float32)
    enc_src = jax.random.normal(k_e, (B, SRC_LEN, HID_DIM), jnp.float32)
    # masks (unused -- see semantics note), kept for signature parity
    trg_mask = jnp.ones((B, 1, TRG_LEN, TRG_LEN), jnp.float32)
    src_mask = jnp.ones((B, 1, 1, SRC_LEN), jnp.float32)

    out, attention = decoder_layer(trg, enc_src, trg_mask, src_mask, params)
    jax.block_until_ready((out, attention))

    assert out.shape == (B, TRG_LEN, HID_DIM)
    assert attention.shape == (B, N_HEADS, TRG_LEN, SRC_LEN)
    print("KERNEL_OK")
</pallas_src>

<mosaic_0001>
module attributes {stable_mosaic.version = 11 : i64} {
  func.func @decoder_layer_kernel(%arg0: memref<16x32xf32, #tpu.memory_space<vmem>>, %arg1: memref<24x32xf32, #tpu.memory_space<vmem>>, %arg2: memref<32x128xbf16, #tpu.memory_space<vmem>>, %arg3: memref<32x128xbf16, #tpu.memory_space<vmem>>, %arg4: memref<32x128xbf16, #tpu.memory_space<vmem>>, %arg5: memref<128x32xbf16, #tpu.memory_space<vmem>>, %arg6: memref<13x128xf32, #tpu.memory_space<vmem>>, %arg7: memref<16x32xf32, #tpu.memory_space<vmem>>, %arg8: memref<2x4x8x12xf32, #tpu.memory_space<vmem>>) attributes {dimension_semantics = [], scalar_prefetch = 0 : i64, scratch_operands = 0 : i64, tpu.core_type = #tpu.core_type<tc>} {
    %c0 = arith.constant 0 : index
    %c0_0 = arith.constant 0 : index
    %0 = vector.load %arg0[%c0, %c0_0] : memref<16x32xf32, #tpu.memory_space<vmem>>, vector<16x32xf32>
    %c0_1 = arith.constant 0 : index
    %c0_2 = arith.constant 0 : index
    %1 = vector.load %arg1[%c0_1, %c0_2] : memref<24x32xf32, #tpu.memory_space<vmem>>, vector<24x32xf32>
    %c0_3 = arith.constant 0 : index
    %c0_4 = arith.constant 0 : index
    %2 = vector.load %arg2[%c0_3, %c0_4] : memref<32x128xbf16, #tpu.memory_space<vmem>>, vector<32x96xbf16>
    %3 = arith.truncf %0 : vector<16x32xf32> to vector<16x32xbf16>
    %cst = arith.constant dense<0.000000e+00> : vector<16x96xf32>
    %4 = tpu.matmul %3, %2, %cst {dimension_numbers = #tpu.dot_dimension_numbers<[1], [0], [0], [1], [0, 0, 1, 1], [], []>} : vector<16x32xbf16>, vector<32x96xbf16>, vector<16x96xf32> -> vector<16x96xf32>
    %c0_5 = arith.constant 0 : index
    %c0_6 = arith.constant 0 : index
    %5 = vector.load %arg6[%c0_5, %c0_6] : memref<13x128xf32, #tpu.memory_space<vmem>>, vector<1x96xf32>
    %6 = vector.broadcast %5 : vector<1x96xf32> to vector<16x96xf32>
    %7 = arith.addf %4, %6 : vector<16x96xf32>
    %8 = vector.shape_cast %7 : vector<16x96xf32> to vector<2x8x96xf32>
    %9 = arith.truncf %8 : vector<2x8x96xf32> to vector<2x8x96xbf16>
    %10 = arith.truncf %8 : vector<2x8x96xf32> to vector<2x8x96xbf16>
    %11 = vector.extract_strided_slice %9 {offsets = [0, 0, 0], sizes = [2, 8, 8], strides = [1, 1, 1]} : vector<2x8x96xbf16> to vector<2x8x8xbf16>
    %12 = vector.extract_strided_slice %10 {offsets = [0, 0, 32], sizes = [2, 8, 8], strides = [1, 1, 1]} : vector<2x8x96xbf16> to vector<2x8x8xbf16>
    "tpu.trace_start"() <{level = 10 : i32, message = "bqd,bkd->bqk"}> : () -> ()
    %cst_7 = arith.constant dense<0.000000e+00> : vector<2x8x8xf32>
    %13 = tpu.matmul %11, %12, %cst_7 {dimension_numbers = #tpu.dot_dimension_numbers<[2], [2], [1], [1], [0, 0, 0, 1, 1, 1], [0], [0]>} : vector<2x8x8xbf16>, vector<2x8x8xbf16>, vector<2x8x8xf32> -> vector<2x8x8xf32>
    "tpu.trace_stop"() : () -> ()
    %14 = vector.extract_strided_slice %9 {offsets = [0, 0, 8], sizes = [2, 8, 8], strides = [1, 1, 1]} : vector<2x8x96xbf16> to vector<2x8x8xbf16>
    %15 = vector.extract_strided_slice %10 {offsets = [0, 0, 40], sizes = [2, 8, 8], strides = [1, 1, 1]} : vector<2x8x96xbf16> to vector<2x8x8xbf16>
    "tpu.trace_start"() <{level = 10 : i32, message = "bqd,bkd->bqk"}> : () -> ()
    %cst_8 = arith.constant dense<0.000000e+00> : vector<2x8x8xf32>
    %16 = tpu.matmul %14, %15, %cst_8 {dimension_numbers = #tpu.dot_dimension_numbers<[2], [2], [1], [1], [0, 0, 0, 1, 1, 1], [0], [0]>} : vector<2x8x8xbf16>, vector<2x8x8xbf16>, vector<2x8x8xf32> -> vector<2x8x8xf32>
    "tpu.trace_stop"() : () -> ()
    %17 = vector.extract_strided_slice %9 {offsets = [0, 0, 16], sizes = [2, 8, 8], strides = [1, 1, 1]} : vector<2x8x96xbf16> to vector<2x8x8xbf16>
    %18 = vector.extract_strided_slice %10 {offsets = [0, 0, 48], sizes = [2, 8, 8], strides = [1, 1, 1]} : vector<2x8x96xbf16> to vector<2x8x8xbf16>
    "tpu.trace_start"() <{level = 10 : i32, message = "bqd,bkd->bqk"}> : () -> ()
    %cst_9 = arith.constant dense<0.000000e+00> : vector<2x8x8xf32>
    %19 = tpu.matmul %17, %18, %cst_9 {dimension_numbers = #tpu.dot_dimension_numbers<[2], [2], [1], [1], [0, 0, 0, 1, 1, 1], [0], [0]>} : vector<2x8x8xbf16>, vector<2x8x8xbf16>, vector<2x8x8xf32> -> vector<2x8x8xf32>
    "tpu.trace_stop"() : () -> ()
    %20 = vector.extract_strided_slice %9 {offsets = [0, 0, 24], sizes = [2, 8, 8], strides = [1, 1, 1]} : vector<2x8x96xbf16> to vector<2x8x8xbf16>
    %21 = vector.extract_strided_slice %10 {offsets = [0, 0, 56], sizes = [2, 8, 8], strides = [1, 1, 1]} : vector<2x8x96xbf16> to vector<2x8x8xbf16>
    "tpu.trace_start"() <{level = 10 : i32, message = "bqd,bkd->bqk"}> : () -> ()
    %cst_10 = arith.constant dense<0.000000e+00> : vector<2x8x8xf32>
    %22 = tpu.matmul %20, %21, %cst_10 {dimension_numbers = #tpu.dot_dimension_numbers<[2], [2], [1], [1], [0, 0, 0, 1, 1, 1], [0], [0]>} : vector<2x8x8xbf16>, vector<2x8x8xbf16>, vector<2x8x8xf32> -> vector<2x8x8xf32>
    "tpu.trace_stop"() : () -> ()
    %23 = vector.shape_cast %13 : vector<2x8x8xf32> to vector<2x1x8x8xf32>
    %24 = vector.shape_cast %16 : vector<2x8x8xf32> to vector<2x1x8x8xf32>
    %25 = vector.shape_cast %19 : vector<2x8x8xf32> to vector<2x1x8x8xf32>
    %26 = vector.shape_cast %22 : vector<2x8x8xf32> to vector<2x1x8x8xf32>
    %27 = tpu.concatenate %23, %24, %25, %26 in 1 : vector<2x1x8x8xf32>, vector<2x1x8x8xf32>, vector<2x1x8x8xf32>, vector<2x1x8x8xf32> -> vector<2x4x8x8xf32>
    %cst_11 = arith.constant 0.353553385 : f32
    %28 = vector.broadcast %cst_11 : f32 to vector<2x4x8x8xf32>
    %29 = arith.mulf %27, %28 : vector<2x4x8x8xf32>
    %cst_12 = arith.constant dense<0xFF800000> : vector<2x4x8xf32>
    %30 = vector.multi_reduction <maximumf>, %29, %cst_12 [3] : vector<2x4x8x8xf32> to vector<2x4x8xf32>
    %31 = vector.shape_cast %30 : vector<2x4x8xf32> to vector<2x4x8x1xf32>
    %32 = vector.broadcast %31 : vector<2x4x8x1xf32> to vector<2x4x8x8xf32>
    %33 = arith.subf %29, %32 : vector<2x4x8x8xf32>
    %34 = math.exp %33 : vector<2x4x8x8xf32>
    %cst_13 = arith.constant dense<0.000000e+00> : vector<2x4x8xf32>
    %35 = vector.multi_reduction <add>, %34, %cst_13 [3] : vector<2x4x8x8xf32> to vector<2x4x8xf32>
    %36 = vector.shape_cast %35 : vector<2x4x8xf32> to vector<2x4x8x1xf32>
    %37 = vector.broadcast %36 : vector<2x4x8x1xf32> to vector<2x4x8x8xf32>
    %38 = arith.divf %34, %37 : vector<2x4x8x8xf32>
    %39 = arith.truncf %38 : vector<2x4x8x8xf32> to vector<2x4x8x8xbf16>
    %40 = vector.extract_strided_slice %39 {offsets = [0, 0, 0, 0], sizes = [2, 1, 8, 8], strides = [1, 1, 1, 1]} : vector<2x4x8x8xbf16> to vector<2x1x8x8xbf16>
    %41 = vector.shape_cast %40 : vector<2x1x8x8xbf16> to vector<2x8x8xbf16>
    %42 = vector.extract_strided_slice %10 {offsets = [0, 0, 64], sizes = [2, 8, 8], strides = [1, 1, 1]} : vector<2x8x96xbf16> to vector<2x8x8xbf16>
    "tpu.trace_start"() <{level = 10 : i32, message = "bqk,bkd->bqd"}> : () -> ()
    %cst_14 = arith.constant dense<0.000000e+00> : vector<2x8x8xf32>
    %43 = tpu.matmul %41, %42, %cst_14 {dimension_numbers = #tpu.dot_dimension_numbers<[2], [1], [1], [2], [0, 0, 0, 1, 1, 2], [0], [0]>} : vector<2x8x8xbf16>, vector<2x8x8xbf16>, vector<2x8x8xf32> -> vector<2x8x8xf32>
    "tpu.trace_stop"() : () -> ()
    %44 = vector.extract_strided_slice %39 {offsets = [0, 1, 0, 0], sizes = [2, 1, 8, 8], strides = [1, 1, 1, 1]} : vector<2x4x8x8xbf16> to vector<2x1x8x8xbf16>
    %45 = vector.shape_cast %44 : vector<2x1x8x8xbf16> to vector<2x8x8xbf16>
    %46 = vector.extract_strided_slice %10 {offsets = [0, 0, 72], sizes = [2, 8, 8], strides = [1, 1, 1]} : vector<2x8x96xbf16> to vector<2x8x8xbf16>
    "tpu.trace_start"() <{level = 10 : i32, message = "bqk,bkd->bqd"}> : () -> ()
    %cst_15 = arith.constant dense<0.000000e+00> : vector<2x8x8xf32>
    %47 = tpu.matmul %45, %46, %cst_15 {dimension_numbers = #tpu.dot_dimension_numbers<[2], [1], [1], [2], [0, 0, 0, 1, 1, 2], [0], [0]>} : vector<2x8x8xbf16>, vector<2x8x8xbf16>, vector<2x8x8xf32> -> vector<2x8x8xf32>
    "tpu.trace_stop"() : () -> ()
    %48 = vector.extract_strided_slice %39 {offsets = [0, 2, 0, 0], sizes = [2, 1, 8, 8], strides = [1, 1, 1, 1]} : vector<2x4x8x8xbf16> to vector<2x1x8x8xbf16>
    %49 = vector.shape_cast %48 : vector<2x1x8x8xbf16> to vector<2x8x8xbf16>
    %50 = vector.extract_strided_slice %10 {offsets = [0, 0, 80], sizes = [2, 8, 8], strides = [1, 1, 1]} : vector<2x8x96xbf16> to vector<2x8x8xbf16>
    "tpu.trace_start"() <{level = 10 : i32, message = "bqk,bkd->bqd"}> : () -> ()
    %cst_16 = arith.constant dense<0.000000e+00> : vector<2x8x8xf32>
    %51 = tpu.matmul %49, %50, %cst_16 {dimension_numbers = #tpu.dot_dimension_numbers<[2], [1], [1], [2], [0, 0, 0, 1, 1, 2], [0], [0]>} : vector<2x8x8xbf16>, vector<2x8x8xbf16>, vector<2x8x8xf32> -> vector<2x8x8xf32>
    "tpu.trace_stop"() : () -> ()
    %52 = vector.extract_strided_slice %39 {offsets = [0, 3, 0, 0], sizes = [2, 1, 8, 8], strides = [1, 1, 1, 1]} : vector<2x4x8x8xbf16> to vector<2x1x8x8xbf16>
    %53 = vector.shape_cast %52 : vector<2x1x8x8xbf16> to vector<2x8x8xbf16>
    %54 = vector.extract_strided_slice %10 {offsets = [0, 0, 88], sizes = [2, 8, 8], strides = [1, 1, 1]} : vector<2x8x96xbf16> to vector<2x8x8xbf16>
    "tpu.trace_start"() <{level = 10 : i32, message = "bqk,bkd->bqd"}> : () -> ()
    %cst_17 = arith.constant dense<0.000000e+00> : vector<2x8x8xf32>
    %55 = tpu.matmul %53, %54, %cst_17 {dimension_numbers = #tpu.dot_dimension_numbers<[2], [1], [1], [2], [0, 0, 0, 1, 1, 2], [0], [0]>} : vector<2x8x8xbf16>, vector<2x8x8xbf16>, vector<2x8x8xf32> -> vector<2x8x8xf32>
    "tpu.trace_stop"() : () -> ()
    %56 = tpu.concatenate %43, %47, %51, %55 in 2 : vector<2x8x8xf32>, vector<2x8x8xf32>, vector<2x8x8xf32>, vector<2x8x8xf32> -> vector<2x8x32xf32>
    %57 = vector.shape_cast %56 : vector<2x8x32xf32> to vector<16x32xf32>
    %c0_18 = arith.constant 0 : index
    %c96 = arith.constant 96 : index
    %58 = vector.load %arg2[%c0_18, %c96] : memref<32x128xbf16, #tpu.memory_space<vmem>>, vector<32x32xbf16>
    %59 = arith.truncf %57 : vector<16x32xf32> to vector<16x32xbf16>
    %cst_19 = arith.constant dense<0.000000e+00> : vector<16x32xf32>
    %60 = tpu.matmul %59, %58, %cst_19 {dimension_numbers = #tpu.dot_dimension_numbers<[1], [0], [0], [1], [0, 0, 1, 1], [], []>} : vector<16x32xbf16>, vector<32x32xbf16>, vector<16x32xf32> -> vector<16x32xf32>
    %c1 = arith.constant 1 : index
    %c0_20 = arith.constant 0 : index
    %61 = vector.load %arg6[%c1, %c0_20] : memref<13x128xf32, #tpu.memory_space<vmem>>, vector<1x32xf32>
    %62 = vector.broadcast %61 : vector<1x32xf32> to vector<16x32xf32>
    %63 = arith.addf %60, %62 : vector<16x32xf32>
    %64 = arith.addf %0, %63 : vector<16x32xf32>
    %c7 = arith.constant 7 : index
    %c0_21 = arith.constant 0 : index
    %65 = vector.load %arg6[%c7, %c0_21] : memref<13x128xf32, #tpu.memory_space<vmem>>, vector<1x32xf32>
    %c8 = arith.constant 8 : index
    %c0_22 = arith.constant 0 : index
    %66 = vector.load %arg6[%c8, %c0_22] : memref<13x128xf32, #tpu.memory_space<vmem>>, vector<1x32xf32>
    %cst_23 = arith.constant dense<0.000000e+00> : vector<16xf32>
    %67 = vector.multi_reduction <add>, %64, %cst_23 [1] : vector<16x32xf32> to vector<16xf32>
    %68 = vector.shape_cast %67 : vector<16xf32> to vector<16x1xf32>
    %cst_24 = arith.constant 3.200000e+01 : f32
    %69 = vector.broadcast %cst_24 : f32 to vector<16x1xf32>
    %70 = arith.divf %68, %69 : vector<16x1xf32>
    %71 = vector.broadcast %70 : vector<16x1xf32> to vector<16x32xf32>
    %72 = arith.subf %64, %71 : vector<16x32xf32>
    %73 = arith.mulf %72, %72 : vector<16x32xf32>
    %cst_25 = arith.constant dense<0.000000e+00> : vector<16xf32>
    %74 = vector.multi_reduction <add>, %73, %cst_25 [1] : vector<16x32xf32> to vector<16xf32>
    %75 = vector.shape_cast %74 : vector<16xf32> to vector<16x1xf32>
    %cst_26 = arith.constant 3.200000e+01 : f32
    %76 = vector.broadcast %cst_26 : f32 to vector<16x1xf32>
    %77 = arith.divf %75, %76 : vector<16x1xf32>
    %78 = vector.broadcast %70 : vector<16x1xf32> to vector<16x32xf32>
    %79 = arith.subf %64, %78 : vector<16x32xf32>
    %cst_27 = arith.constant 9.99999974E-6 : f32
    %80 = vector.broadcast %cst_27 : f32 to vector<16x1xf32>
    %81 = arith.addf %77, %80 : vector<16x1xf32>
    %82 = math.rsqrt %81 : vector<16x1xf32>
    %83 = vector.broadcast %82 : vector<16x1xf32> to vector<16x32xf32>
    %84 = arith.mulf %79, %83 : vector<16x32xf32>
    %85 = vector.broadcast %65 : vector<1x32xf32> to vector<16x32xf32>
    %86 = arith.mulf %84, %85 : vector<16x32xf32>
    %87 = vector.broadcast %66 : vector<1x32xf32> to vector<16x32xf32>
    %88 = arith.addf %86, %87 : vector<16x32xf32>
    %c0_28 = arith.constant 0 : index
    %c0_29 = arith.constant 0 : index
    %89 = vector.load %arg3[%c0_28, %c0_29] : memref<32x128xbf16, #tpu.memory_space<vmem>>, vector<32x32xbf16>
    %90 = arith.truncf %88 : vector<16x32xf32> to vector<16x32xbf16>
    %cst_30 = arith.constant dense<0.000000e+00> : vector<16x32xf32>
    %91 = tpu.matmul %90, %89, %cst_30 {dimension_numbers = #tpu.dot_dimension_numbers<[1], [0], [0], [1], [0, 0, 1, 1], [], []>} : vector<16x32xbf16>, vector<32x32xbf16>, vector<16x32xf32> -> vector<16x32xf32>
    %c2 = arith.constant 2 : index
    %c0_31 = arith.constant 0 : index
    %92 = vector.load %arg6[%c2, %c0_31] : memref<13x128xf32, #tpu.memory_space<vmem>>, vector<1x32xf32>
    %93 = vector.broadcast %92 : vector<1x32xf32> to vector<16x32xf32>
    %94 = arith.addf %91, %93 : vector<16x32xf32>
    %c0_32 = arith.constant 0 : index
    %c32 = arith.constant 32 : index
    %95 = vector.load %arg3[%c0_32, %c32] : memref<32x128xbf16, #tpu.memory_space<vmem>>, vector<32x64xbf16>
    %96 = arith.truncf %1 : vector<24x32xf32> to vector<24x32xbf16>
    %cst_33 = arith.constant dense<0.000000e+00> : vector<24x64xf32>
    %97 = tpu.matmul %96, %95, %cst_33 {dimension_numbers = #tpu.dot_dimension_numbers<[1], [0], [0], [1], [0, 0, 1, 1], [], []>} : vector<24x32xbf16>, vector<32x64xbf16>, vector<24x64xf32> -> vector<24x64xf32>
    %c3 = arith.constant 3 : index
    %c0_34 = arith.constant 0 : index
    %98 = vector.load %arg6[%c3, %c0_34] : memref<13x128xf32, #tpu.memory_space<vmem>>, vector<1x64xf32>
    %99 = vector.broadcast %98 : vector<1x64xf32> to vector<24x64xf32>
    %100 = arith.addf %97, %99 : vector<24x64xf32>
    %101 = vector.shape_cast %94 : vector<16x32xf32> to vector<2x8x32xf32>
    %102 = vector.extract_strided_slice %100 {offsets = [0, 0], sizes = [12, 64], strides = [1, 1]} : vector<24x64xf32> to vector<12x64xf32>
    %103 = vector.extract_strided_slice %100 {offsets = [12, 0], sizes = [12, 64], strides = [1, 1]} : vector<24x64xf32> to vector<12x64xf32>
    %104 = vector.shape_cast %102 : vector<12x64xf32> to vector<1x12x64xf32>
    %105 = vector.shape_cast %103 : vector<12x64xf32> to vector<1x12x64xf32>
    %106 = tpu.concatenate %104, %105 in 0 : vector<1x12x64xf32>, vector<1x12x64xf32> -> vector<2x12x64xf32>
    %107 = arith.truncf %101 : vector<2x8x32xf32> to vector<2x8x32xbf16>
    %108 = arith.truncf %106 : vector<2x12x64xf32> to vector<2x12x64xbf16>
    %109 = vector.extract_strided_slice %107 {offsets = [0, 0, 0], sizes = [2, 8, 8], strides = [1, 1, 1]} : vector<2x8x32xbf16> to vector<2x8x8xbf16>
    %110 = vector.extract_strided_slice %108 {offsets = [0, 0, 0], sizes = [2, 12, 8], strides = [1, 1, 1]} : vector<2x12x64xbf16> to vector<2x12x8xbf16>
    "tpu.trace_start"() <{level = 10 : i32, message = "bqd,bkd->bqk"}> : () -> ()
    %cst_35 = arith.constant dense<0.000000e+00> : vector<2x8x12xf32>
    %111 = tpu.matmul %109, %110, %cst_35 {dimension_numbers = #tpu.dot_dimension_numbers<[2], [2], [1], [1], [0, 0, 0, 1, 1, 1], [0], [0]>} : vector<2x8x8xbf16>, vector<2x12x8xbf16>, vector<2x8x12xf32> -> vector<2x8x12xf32>
    "tpu.trace_stop"() : () -> ()
    %112 = vector.extract_strided_slice %107 {offsets = [0, 0, 8], sizes = [2, 8, 8], strides = [1, 1, 1]} : vector<2x8x32xbf16> to vector<2x8x8xbf16>
    %113 = vector.extract_strided_slice %108 {offsets = [0, 0, 8], sizes = [2, 12, 8], strides = [1, 1, 1]} : vector<2x12x64xbf16> to vector<2x12x8xbf16>
    "tpu.trace_start"() <{level = 10 : i32, message = "bqd,bkd->bqk"}> : () -> ()
    %cst_36 = arith.constant dense<0.000000e+00> : vector<2x8x12xf32>
    %114 = tpu.matmul %112, %113, %cst_36 {dimension_numbers = #tpu.dot_dimension_numbers<[2], [2], [1], [1], [0, 0, 0, 1, 1, 1], [0], [0]>} : vector<2x8x8xbf16>, vector<2x12x8xbf16>, vector<2x8x12xf32> -> vector<2x8x12xf32>
    "tpu.trace_stop"() : () -> ()
    %115 = vector.extract_strided_slice %107 {offsets = [0, 0, 16], sizes = [2, 8, 8], strides = [1, 1, 1]} : vector<2x8x32xbf16> to vector<2x8x8xbf16>
    %116 = vector.extract_strided_slice %108 {offsets = [0, 0, 16], sizes = [2, 12, 8], strides = [1, 1, 1]} : vector<2x12x64xbf16> to vector<2x12x8xbf16>
    "tpu.trace_start"() <{level = 10 : i32, message = "bqd,bkd->bqk"}> : () -> ()
    %cst_37 = arith.constant dense<0.000000e+00> : vector<2x8x12xf32>
    %117 = tpu.matmul %115, %116, %cst_37 {dimension_numbers = #tpu.dot_dimension_numbers<[2], [2], [1], [1], [0, 0, 0, 1, 1, 1], [0], [0]>} : vector<2x8x8xbf16>, vector<2x12x8xbf16>, vector<2x8x12xf32> -> vector<2x8x12xf32>
    "tpu.trace_stop"() : () -> ()
    %118 = vector.extract_strided_slice %107 {offsets = [0, 0, 24], sizes = [2, 8, 8], strides = [1, 1, 1]} : vector<2x8x32xbf16> to vector<2x8x8xbf16>
    %119 = vector.extract_strided_slice %108 {offsets = [0, 0, 24], sizes = [2, 12, 8], strides = [1, 1, 1]} : vector<2x12x64xbf16> to vector<2x12x8xbf16>
    "tpu.trace_start"() <{level = 10 : i32, message = "bqd,bkd->bqk"}> : () -> ()
    %cst_38 = arith.constant dense<0.000000e+00> : vector<2x8x12xf32>
    %120 = tpu.matmul %118, %119, %cst_38 {dimension_numbers = #tpu.dot_dimension_numbers<[2], [2], [1], [1], [0, 0, 0, 1, 1, 1], [0], [0]>} : vector<2x8x8xbf16>, vector<2x12x8xbf16>, vector<2x8x12xf32> -> vector<2x8x12xf32>
    "tpu.trace_stop"() : () -> ()
    %121 = vector.shape_cast %111 : vector<2x8x12xf32> to vector<2x1x8x12xf32>
    %122 = vector.shape_cast %114 : vector<2x8x12xf32> to vector<2x1x8x12xf32>
    %123 = vector.shape_cast %117 : vector<2x8x12xf32> to vector<2x1x8x12xf32>
    %124 = vector.shape_cast %120 : vector<2x8x12xf32> to vector<2x1x8x12xf32>
    %125 = tpu.concatenate %121, %122, %123, %124 in 1 : vector<2x1x8x12xf32>, vector<2x1x8x12xf32>, vector<2x1x8x12xf32>, vector<2x1x8x12xf32> -> vector<2x4x8x12xf32>
    %cst_39 = arith.constant 0.353553385 : f32
    %126 = vector.broadcast %cst_39 : f32 to vector<2x4x8x12xf32>
    %127 = arith.mulf %125, %126 : vector<2x4x8x12xf32>
    %cst_40 = arith.constant dense<0xFF800000> : vector<2x4x8xf32>
    %128 = vector.multi_reduction <maximumf>, %127, %cst_40 [3] : vector<2x4x8x12xf32> to vector<2x4x8xf32>
    %129 = vector.shape_cast %128 : vector<2x4x8xf32> to vector<2x4x8x1xf32>
    %130 = vector.broadcast %129 : vector<2x4x8x1xf32> to vector<2x4x8x12xf32>
    %131 = arith.subf %127, %130 : vector<2x4x8x12xf32>
    %132 = math.exp %131 : vector<2x4x8x12xf32>
    %cst_41 = arith.constant dense<0.000000e+00> : vector<2x4x8xf32>
    %133 = vector.multi_reduction <add>, %132, %cst_41 [3] : vector<2x4x8x12xf32> to vector<2x4x8xf32>
    %134 = vector.shape_cast %133 : vector<2x4x8xf32> to vector<2x4x8x1xf32>
    %135 = vector.broadcast %134 : vector<2x4x8x1xf32> to vector<2x4x8x12xf32>
    %136 = arith.divf %132, %135 : vector<2x4x8x12xf32>
    %137 = arith.truncf %136 : vector<2x4x8x12xf32> to vector<2x4x8x12xbf16>
    %138 = vector.extract_strided_slice %137 {offsets = [0, 0, 0, 0], sizes = [2, 1, 8, 12], strides = [1, 1, 1, 1]} : vector<2x4x8x12xbf16> to vector<2x1x8x12xbf16>
    %139 = vector.shape_cast %138 : vector<2x1x8x12xbf16> to vector<2x8x12xbf16>
    %140 = vector.extract_strided_slice %108 {offsets = [0, 0, 32], sizes = [2, 12, 8], strides = [1, 1, 1]} : vector<2x12x64xbf16> to vector<2x12x8xbf16>
    "tpu.trace_start"() <{level = 10 : i32, message = "bqk,bkd->bqd"}> : () -> ()
    %cst_42 = arith.constant dense<0.000000e+00> : vector<2x8x8xf32>
    %141 = tpu.matmul %139, %140, %cst_42 {dimension_numbers = #tpu.dot_dimension_numbers<[2], [1], [1], [2], [0, 0, 0, 1, 1, 2], [0], [0]>} : vector<2x8x12xbf16>, vector<2x12x8xbf16>, vector<2x8x8xf32> -> vector<2x8x8xf32>
    "tpu.trace_stop"() : () -> ()
    %142 = vector.extract_strided_slice %137 {offsets = [0, 1, 0, 0], sizes = [2, 1, 8, 12], strides = [1, 1, 1, 1]} : vector<2x4x8x12xbf16> to vector<2x1x8x12xbf16>
    %143 = vector.shape_cast %142 : vector<2x1x8x12xbf16> to vector<2x8x12xbf16>
    %144 = vector.extract_strided_slice %108 {offsets = [0, 0, 40], sizes = [2, 12, 8], strides = [1, 1, 1]} : vector<2x12x64xbf16> to vector<2x12x8xbf16>
    "tpu.trace_start"() <{level = 10 : i32, message = "bqk,bkd->bqd"}> : () -> ()
    %cst_43 = arith.constant dense<0.000000e+00> : vector<2x8x8xf32>
    %145 = tpu.matmul %143, %144, %cst_43 {dimension_numbers = #tpu.dot_dimension_numbers<[2], [1], [1], [2], [0, 0, 0, 1, 1, 2], [0], [0]>} : vector<2x8x12xbf16>, vector<2x12x8xbf16>, vector<2x8x8xf32> -> vector<2x8x8xf32>
    "tpu.trace_stop"() : () -> ()
    %146 = vector.extract_strided_slice %137 {offsets = [0, 2, 0, 0], sizes = [2, 1, 8, 12], strides = [1, 1, 1, 1]} : vector<2x4x8x12xbf16> to vector<2x1x8x12xbf16>
    %147 = vector.shape_cast %146 : vector<2x1x8x12xbf16> to vector<2x8x12xbf16>
    %148 = vector.extract_strided_slice %108 {offsets = [0, 0, 48], sizes = [2, 12, 8], strides = [1, 1, 1]} : vector<2x12x64xbf16> to vector<2x12x8xbf16>
    "tpu.trace_start"() <{level = 10 : i32, message = "bqk,bkd->bqd"}> : () -> ()
    %cst_44 = arith.constant dense<0.000000e+00> : vector<2x8x8xf32>
    %149 = tpu.matmul %147, %148, %cst_44 {dimension_numbers = #tpu.dot_dimension_numbers<[2], [1], [1], [2], [0, 0, 0, 1, 1, 2], [0], [0]>} : vector<2x8x12xbf16>, vector<2x12x8xbf16>, vector<2x8x8xf32> -> vector<2x8x8xf32>
    "tpu.trace_stop"() : () -> ()
    %150 = vector.extract_strided_slice %137 {offsets = [0, 3, 0, 0], sizes = [2, 1, 8, 12], strides = [1, 1, 1, 1]} : vector<2x4x8x12xbf16> to vector<2x1x8x12xbf16>
    %151 = vector.shape_cast %150 : vector<2x1x8x12xbf16> to vector<2x8x12xbf16>
    %152 = vector.extract_strided_slice %108 {offsets = [0, 0, 56], sizes = [2, 12, 8], strides = [1, 1, 1]} : vector<2x12x64xbf16> to vector<2x12x8xbf16>
    "tpu.trace_start"() <{level = 10 : i32, message = "bqk,bkd->bqd"}> : () -> ()
    %cst_45 = arith.constant dense<0.000000e+00> : vector<2x8x8xf32>
    %153 = tpu.matmul %151, %152, %cst_45 {dimension_numbers = #tpu.dot_dimension_numbers<[2], [1], [1], [2], [0, 0, 0, 1, 1, 2], [0], [0]>} : vector<2x8x12xbf16>, vector<2x12x8xbf16>, vector<2x8x8xf32> -> vector<2x8x8xf32>
    "tpu.trace_stop"() : () -> ()
    %154 = tpu.concatenate %141, %145, %149, %153 in 2 : vector<2x8x8xf32>, vector<2x8x8xf32>, vector<2x8x8xf32>, vector<2x8x8xf32> -> vector<2x8x32xf32>
    %155 = vector.shape_cast %154 : vector<2x8x32xf32> to vector<16x32xf32>
    %c0_46 = arith.constant 0 : index
    %c96_47 = arith.constant 96 : index
    %156 = vector.load %arg3[%c0_46, %c96_47] : memref<32x128xbf16, #tpu.memory_space<vmem>>, vector<32x32xbf16>
    %157 = arith.truncf %155 : vector<16x32xf32> to vector<16x32xbf16>
    %cst_48 = arith.constant dense<0.000000e+00> : vector<16x32xf32>
    %158 = tpu.matmul %157, %156, %cst_48 {dimension_numbers = #tpu.dot_dimension_numbers<[1], [0], [0], [1], [0, 0, 1, 1], [], []>} : vector<16x32xbf16>, vector<32x32xbf16>, vector<16x32xf32> -> vector<16x32xf32>
    %c4 = arith.constant 4 : index
    %c0_49 = arith.constant 0 : index
    %159 = vector.load %arg6[%c4, %c0_49] : memref<13x128xf32, #tpu.memory_space<vmem>>, vector<1x32xf32>
    %160 = vector.broadcast %159 : vector<1x32xf32> to vector<16x32xf32>
    %161 = arith.addf %158, %160 : vector<16x32xf32>
    %162 = arith.addf %88, %161 : vector<16x32xf32>
    %c9 = arith.constant 9 : index
    %c0_50 = arith.constant 0 : index
    %163 = vector.load %arg6[%c9, %c0_50] : memref<13x128xf32, #tpu.memory_space<vmem>>, vector<1x32xf32>
    %c10 = arith.constant 10 : index
    %c0_51 = arith.constant 0 : index
    %164 = vector.load %arg6[%c10, %c0_51] : memref<13x128xf32, #tpu.memory_space<vmem>>, vector<1x32xf32>
    %cst_52 = arith.constant dense<0.000000e+00> : vector<16xf32>
    %165 = vector.multi_reduction <add>, %162, %cst_52 [1] : vector<16x32xf32> to vector<16xf32>
    %166 = vector.shape_cast %165 : vector<16xf32> to vector<16x1xf32>
    %cst_53 = arith.constant 3.200000e+01 : f32
    %167 = vector.broadcast %cst_53 : f32 to vector<16x1xf32>
    %168 = arith.divf %166, %167 : vector<16x1xf32>
    %169 = vector.broadcast %168 : vector<16x1xf32> to vector<16x32xf32>
    %170 = arith.subf %162, %169 : vector<16x32xf32>
    %171 = arith.mulf %170, %170 : vector<16x32xf32>
    %cst_54 = arith.constant dense<0.000000e+00> : vector<16xf32>
    %172 = vector.multi_reduction <add>, %171, %cst_54 [1] : vector<16x32xf32> to vector<16xf32>
    %173 = vector.shape_cast %172 : vector<16xf32> to vector<16x1xf32>
    %cst_55 = arith.constant 3.200000e+01 : f32
    %174 = vector.broadcast %cst_55 : f32 to vector<16x1xf32>
    %175 = arith.divf %173, %174 : vector<16x1xf32>
    %176 = vector.broadcast %168 : vector<16x1xf32> to vector<16x32xf32>
    %177 = arith.subf %162, %176 : vector<16x32xf32>
    %cst_56 = arith.constant 9.99999974E-6 : f32
    %178 = vector.broadcast %cst_56 : f32 to vector<16x1xf32>
    %179 = arith.addf %175, %178 : vector<16x1xf32>
    %180 = math.rsqrt %179 : vector<16x1xf32>
    %181 = vector.broadcast %180 : vector<16x1xf32> to vector<16x32xf32>
    %182 = arith.mulf %177, %181 : vector<16x32xf32>
    %183 = vector.broadcast %163 : vector<1x32xf32> to vector<16x32xf32>
    %184 = arith.mulf %182, %183 : vector<16x32xf32>
    %185 = vector.broadcast %164 : vector<1x32xf32> to vector<16x32xf32>
    %186 = arith.addf %184, %185 : vector<16x32xf32>
    %c0_57 = arith.constant 0 : index
    %c0_58 = arith.constant 0 : index
    %187 = vector.load %arg4[%c0_57, %c0_58] : memref<32x128xbf16, #tpu.memory_space<vmem>>, vector<32x128xbf16>
    %188 = arith.truncf %186 : vector<16x32xf32> to vector<16x32xbf16>
    %cst_59 = arith.constant dense<0.000000e+00> : vector<16x128xf32>
    %189 = tpu.matmul %188, %187, %cst_59 {dimension_numbers = #tpu.dot_dimension_numbers<[1], [0], [0], [1], [0, 0, 1, 1], [], []>} : vector<16x32xbf16>, vector<32x128xbf16>, vector<16x128xf32> -> vector<16x128xf32>
    %c5 = arith.constant 5 : index
    %c0_60 = arith.constant 0 : index
    %190 = vector.load %arg6[%c5, %c0_60] : memref<13x128xf32, #tpu.memory_space<vmem>>, vector<1x128xf32>
    %191 = vector.broadcast %190 : vector<1x128xf32> to vector<16x128xf32>
    %192 = arith.addf %189, %191 : vector<16x128xf32>
    %cst_61 = arith.constant 0.000000e+00 : f32
    %193 = vector.broadcast %cst_61 : f32 to vector<16x128xf32>
    %194 = arith.maximumf %192, %193 : vector<16x128xf32>
    %c0_62 = arith.constant 0 : index
    %c0_63 = arith.constant 0 : index
    %195 = vector.load %arg5[%c0_62, %c0_63] : memref<128x32xbf16, #tpu.memory_space<vmem>>, vector<128x32xbf16>
    %196 = arith.truncf %194 : vector<16x128xf32> to vector<16x128xbf16>
    %cst_64 = arith.constant dense<0.000000e+00> : vector<16x32xf32>
    %197 = tpu.matmul %196, %195, %cst_64 {dimension_numbers = #tpu.dot_dimension_numbers<[1], [0], [0], [1], [0, 0, 1, 1], [], []>} : vector<16x128xbf16>, vector<128x32xbf16>, vector<16x32xf32> -> vector<16x32xf32>
    %c6 = arith.constant 6 : index
    %c0_65 = arith.constant 0 : index
    %198 = vector.load %arg6[%c6, %c0_65] : memref<13x128xf32, #tpu.memory_space<vmem>>, vector<1x32xf32>
    %199 = vector.broadcast %198 : vector<1x32xf32> to vector<16x32xf32>
    %200 = arith.addf %197, %199 : vector<16x32xf32>
    %201 = arith.addf %186, %200 : vector<16x32xf32>
    %c11 = arith.constant 11 : index
    %c0_66 = arith.constant 0 : index
    %202 = vector.load %arg6[%c11, %c0_66] : memref<13x128xf32, #tpu.memory_space<vmem>>, vector<1x32xf32>
    %c12 = arith.constant 12 : index
    %c0_67 = arith.constant 0 : index
    %203 = vector.load %arg6[%c12, %c0_67] : memref<13x128xf32, #tpu.memory_space<vmem>>, vector<1x32xf32>
    %cst_68 = arith.constant dense<0.000000e+00> : vector<16xf32>
    %204 = vector.multi_reduction <add>, %201, %cst_68 [1] : vector<16x32xf32> to vector<16xf32>
    %205 = vector.shape_cast %204 : vector<16xf32> to vector<16x1xf32>
    %cst_69 = arith.constant 3.200000e+01 : f32
    %206 = vector.broadcast %cst_69 : f32 to vector<16x1xf32>
    %207 = arith.divf %205, %206 : vector<16x1xf32>
    %208 = vector.broadcast %207 : vector<16x1xf32> to vector<16x32xf32>
    %209 = arith.subf %201, %208 : vector<16x32xf32>
    %210 = arith.mulf %209, %209 : vector<16x32xf32>
    %cst_70 = arith.constant dense<0.000000e+00> : vector<16xf32>
    %211 = vector.multi_reduction <add>, %210, %cst_70 [1] : vector<16x32xf32> to vector<16xf32>
    %212 = vector.shape_cast %211 : vector<16xf32> to vector<16x1xf32>
    %cst_71 = arith.constant 3.200000e+01 : f32
    %213 = vector.broadcast %cst_71 : f32 to vector<16x1xf32>
    %214 = arith.divf %212, %213 : vector<16x1xf32>
    %215 = vector.broadcast %207 : vector<16x1xf32> to vector<16x32xf32>
    %216 = arith.subf %201, %215 : vector<16x32xf32>
    %cst_72 = arith.constant 9.99999974E-6 : f32
    %217 = vector.broadcast %cst_72 : f32 to vector<16x1xf32>
    %218 = arith.addf %214, %217 : vector<16x1xf32>
    %219 = math.rsqrt %218 : vector<16x1xf32>
    %220 = vector.broadcast %219 : vector<16x1xf32> to vector<16x32xf32>
    %221 = arith.mulf %216, %220 : vector<16x32xf32>
    %222 = vector.broadcast %202 : vector<1x32xf32> to vector<16x32xf32>
    %223 = arith.mulf %221, %222 : vector<16x32xf32>
    %224 = vector.broadcast %203 : vector<1x32xf32> to vector<16x32xf32>
    %225 = arith.addf %223, %224 : vector<16x32xf32>
    %c0_73 = arith.constant 0 : index
    %c0_74 = arith.constant 0 : index
    %226 = vector.load %arg7[%c0_73, %c0_74] : memref<16x32xf32, #tpu.memory_space<vmem>>, vector<16x32xf32>
    tpu.vector_store %arg7[%c0_73, %c0_74], %225 {strides = array<i32>} : memref<16x32xf32, #tpu.memory_space<vmem>>, vector<16x32xf32>,
    %c0_75 = arith.constant 0 : index
    %c0_76 = arith.constant 0 : index
    %c0_77 = arith.constant 0 : index
    %c0_78 = arith.constant 0 : index
    %227 = vector.load %arg8[%c0_75, %c0_76, %c0_77, %c0_78] : memref<2x4x8x12xf32, #tpu.memory_space<vmem>>, vector<2x4x8x12xf32>
    tpu.vector_store %arg8[%c0_75, %c0_76, %c0_77, %c0_78], %136 {strides = array<i32>} : memref<2x4x8x12xf32, #tpu.memory_space<vmem>>, vector<2x4x8x12xf32>,
    return
  }
}

</mosaic_0001>

<bundles_post_ra>
// kernel: tpu_custom_call.1
= control target key start
LH: loop header
LB: loop body
LE: loop exit
PB: predicated region body
PF: predicated region fallthrough
CT: control target
= control target key end

     0   :  { %14 = vsyncpa [#allocation3], 0  ;;  %s3852_s0 = inlined_call_operand.vmem [shape: f32[16,32], index: 0, kind: input, shape index: {}]   ;;  %s3853_s1 = inlined_call_operand.vmem [shape: f32[24,32], index: 1, kind: input, shape index: {}]   ;;  %s3854_s2 = inlined_call_operand.vmem [shape: bf16[32,128], index: 2, kind: input, shape index: {}]   ;;  %s3855_s3 = inlined_call_operand.vmem [shape: bf16[32,128], index: 3, kind: input, shape index: {}]   ;;  %s3856_s4 = inlined_call_operand.hbm [shape: bf16[32,128], index: 4, kind: input, shape index: {}]   ;;  %s3857_s5 = inlined_call_operand.vmem [shape: bf16[128,32], index: 5, kind: input, shape index: {}]   ;;  %s3858_s6 = inlined_call_operand.vmem [shape: f32[13,128], index: 6, kind: input, shape index: {}]   ;;  %s3859_s7 = inlined_call_operand.hbm [shape: f32[16,32], index: 7, kind: output, shape index: {0}]   ;;  %s3860_s8 = inlined_call_operand.hbm [shape: f32[2,4,8,12], index: 8, kind: output, shape index: {1}]  }
   0x1   :  { %15 = vsyncpa [#allocation4], 0 }
   0x2   :  { %16 = vsyncpa [#allocation7], 0  ;;  %s3222_s27 = smov [#allocation2]  }
   0x3   :  { %s30_s28 = sshll.u32 %s3222_s27, 4  ;;  %s31_s28 = int_to_ptr.vmem [resolvable:$true] %s30_s28 }
   0x4   :  { %s3164_s29 = scalar_lea.vmem %s31_s28, 256  ;;  %p3169_p1 = scmp.lt.s32.totalorder %s31_s28, %s31_s28 }
   0x5   :  { %p3165_p0 = scmp.ne.s32.totalorder %s31_s28, %s3164_s29  ;;  %p3170_p2 = scmp.lt.s32.totalorder %s3164_s29, %s3164_s29 }
   0x7   :  { %p3171_p3 = por %p3170_p2, %p3169_p1 }
   0x9   :  { %p3172_p4 = pnand %p3171_p3, %p3165_p0 }
   0xb   :  { %3175 = shalt.err (!%p3172_p4)
}
   0xc   :  { %s3223_s30 = smov 64   ;;  %s3224_s9 = smov 4  }
   0xd   :  { %36 = dma.hbm_to_vmem [thread:$0]  %s3856_s4, 256, %s31_s28, [#allocation3], %s3223_s30, %s3223_s30, %s3224_s9  }
   0xe   :  { %3216 = dma.done.wait [#allocation3], 256  }
   0xf   :  { %3217 = vsyncadd [#allocation3], 4294967040  ;;  %v3225_v0 = vmov 0.0   ;;  %vm3226_vm0 = vmmov 0   ;;  %v3062_v1 = vld [vmem:[%s3854_s2 + $0x8] sm:$0xff]   ;;  %v3063_v2 = vld [vmem:[%s3854_s2] sm:$0xff]  }
  0x10   :  { %2750 = vmatprep.subr.bf16.mxu1 %v3225_v0  ;;  %2754 = vmatprep.mubr.msk.bf16.mxu1 %vm3226_vm0, %v3225_v0  ;;  %v3309_v3 = vld [vmem:[%s3852_s0] sm:$0xff]  ;;  %v3314_v4 = vld [vmem:[%s3852_s0 + $0x8] sm:$0xff]  ;;  %vm72_vm1 = vcmask 261120   ;;  %s3227_s0 = smov 88   ;;  %s3228_s21 = smov 96   ;;  %vm122_vm2 = vcmask 64512  }
  0x11   :  { %2776 = vmatprep.subr.bf16.mxu0 %v3225_v0  ;;  %2778 = vmatprep.mubr.msk.bf16.mxu0 %vm3226_vm0, %v3225_v0  ;;  %v54_v5 = vpack.c.bf16 %v3314_v4, %v3309_v3  ;;  %v2588_v6 = vld [vmem:[%s3858_s6] ss:$0 sm:$0xff]  ;;  %s3229_s22 = smov 120   ;;  %s3230_s23 = smov 80   ;;  %vm627_vm3 = vcmask 1043456   ;;  %vm1033_vm4 = vcmask 130048  }
  0x12   :  { %2751 = vmatpush3.bf16.msra.mxu1 %v3062_v1  ;;  %s3231_s24 = smov 112   ;;  %s3232_s25 = smov 72   ;;  %vm1036_vm5 = vcmask 195584   ;;  %vm1802_vm6 = vcmask 1045504   ;;  %vm1700_vm7 = vcmask 97280  }
  0x13   :  { %2752 = vmatprep.subr.bf16.mxu1 %v3225_v0  ;;  %s3233_s26 = smov 104   ;;  %s3234_s27 = smov 56  }
  0x14   :  { %s3235_s28 = smov 48   ;;  %s3236_s29 = smov 40  }
  0x15   :  { %s3237_s10 = smov 32   ;;  %s3238_s11 = smov 8  }
  0x16   :  { %2753 = vmatpush3.bf16.msra.mxu1 %v3063_v2  ;;  %s3239_s12 = smov 16   ;;  %s3240_s14 = smov 24  }
  0x17   :  { %2758 = vmatprep.subr.bf16.mxu1 %v3225_v0 }
  0x19   :  { %2755 = vmatmul.mubr.msk.bf16.vlgmr.msra.gmra.mxu1 %vm72_vm1, %v54_v5 }
  0x1a   :  { %2760 = vmatprep.mubr.msk.bf16.mxu1 %vm3226_vm0, %v3225_v0 }
  0xd9   :  { %v110_v7 = vpop.f32.mrf.mxu1 }
  0xda   :  { %v111_v8 = vadd.f32 %v2588_v6, %v110_v7 }
  0xdb   :  { %v2756_v9 = vpop.f32.mrf.mxu1 }
  0xdc   :  { %v3326_v10 = vpack.c.bf16 %v111_v8, %v111_v8 }
  0xdd   :  { %v113_v11 = vpop.f32.mrf.mxu1 }
  0xde   :  { %v114_v12 = vadd.f32 %v2588_v6, %v113_v11  ;;  %220 = vrot.lane.b32.xlu1 %v3326_v10, %s3227_s0  ;;  %120 = vrot.lane.b32.xlu0 %v3326_v10, %s3228_s21 }
  0xdf   :  { %v2757_v13 = vpop.f32.mrf.mxu1 }
  0xe0   :  { %v3332_v14 = vpack.c.bf16 %v114_v12, %v114_v12 }
  0xe2   :  { %270 = vrot.lane.b32.xlu1 %v3332_v14, %s3227_s0  ;;  %170 = vrot.lane.b32.xlu0 %v3332_v14, %s3228_s21 }
  0xe6   :  { %268 = vrot.lane.b32.xlu1 %v3332_v14, %s3229_s22  ;;  %218 = vrot.lane.b32.xlu0 %v3326_v10, %s3229_s22 }
  0xea   :  { %370 = vrot.lane.b32.xlu1 %v3332_v14, %s3230_s23  ;;  %320 = vrot.lane.b32.xlu0 %v3326_v10, %s3230_s23 }
  0xee   :  { %368 = vrot.lane.b32.xlu1 %v3332_v14, %s3231_s24  ;;  %318 = vrot.lane.b32.xlu0 %v3326_v10, %s3231_s24 }
  0xf2   :  { %470 = vrot.lane.b32.xlu1 %v3332_v14, %s3232_s25  ;;  %420 = vrot.lane.b32.xlu0 %v3326_v10, %s3232_s25 }
  0xf6   :  { %468 = vrot.lane.b32.xlu1 %v3332_v14, %s3233_s26  ;;  %418 = vrot.lane.b32.xlu0 %v3326_v10, %s3233_s26 }
  0xfa   :  { %622 = vrot.lane.b32.xlu1 %v3326_v10, %s3223_s30 }
 0x150   :  { %v221_v15 = vpop.permute.xlu1 %220  ;;  %v121_v16 = vpop.permute.xlu0 %120 }
 0x151   :  { %v127_v17 = vsel %vm122_vm2, %v121_v16, 0  ;;  %v226_v27 = vsel %vm122_vm2, %v221_v15, 0 }
 0x152   :  { %2759 = vmatpush3.bf16.xpose.msra.mxu1 %v127_v17 }
 0x153   :  { %2764 = vmatprep.subr.bf16.mxu1 %v3225_v0 }
 0x154   :  { %v271_v18 = vpop.permute.xlu1 %270  ;;  %v171_v20 = vpop.permute.xlu0 %170 }
 0x155   :  { %v276_v19 = vsel %vm122_vm2, %v271_v18, 0  ;;  %v176_v22 = vsel %vm122_vm2, %v171_v20, 0 }
 0x156   :  { %2777 = vmatpush3.bf16.xpose.msra.mxu0 %v276_v19 }
 0x157   :  { %2788 = vmatprep.subr.bf16.mxu0 %v3225_v0 }
 0x158   :  { %v269_v21 = vpop.permute.xlu1 %268  ;;  %v219_v23 = vpop.permute.xlu0 %218 }
 0x159   :  { %2761 = vmatmul.mubr.msk.bf16.vlgmr.msra.gmra.mxu1 %vm122_vm2, %v3326_v10 }
 0x15a   :  { %2765 = vmatpush3.bf16.xpose.msra.mxu1 %v176_v22  ;;  %2766 = vmatprep.mubr.msk.bf16.mxu1 %vm3226_vm0, %v3225_v0 }
 0x15b   :  { %2770 = vmatprep.subr.bf16.mxu1 %v3225_v0 }
 0x15c   :  { %v371_v24 = vpop.permute.xlu1 %370  ;;  %v321_v28 = vpop.permute.xlu0 %320 }
 0x15d   :  { %v376_v25 = vsel %vm122_vm2, %v371_v24, 0  ;;  %2779 = vmatmul.mubr.msk.bf16.vlgmr.msra.gmra.mxu0 %vm122_vm2, %v269_v21  ;;  %v326_v32 = vsel %vm122_vm2, %v321_v28, 0 }
 0x15e   :  { %2789 = vmatpush3.bf16.xpose.msra.mxu0 %v376_v25  ;;  %2790 = vmatprep.mubr.msk.bf16.mxu0 %vm3226_vm0, %v3225_v0 }
 0x15f   :  { %2800 = vmatprep.subr.bf16.mxu0 %v3225_v0 }
 0x160   :  { %v369_v26 = vpop.permute.xlu1 %368  ;;  %v319_v31 = vpop.permute.xlu0 %318 }
 0x161   :  { %2767 = vmatmul.mubr.msk.bf16.vlgmr.msra.gmra.mxu1 %vm122_vm2, %v3332_v14 }
 0x162   :  { %2771 = vmatpush3.bf16.xpose.msra.mxu1 %v226_v27  ;;  %2772 = vmatprep.mubr.msk.bf16.mxu1 %vm3226_vm0, %v3225_v0 }
 0x163   :  { %2782 = vmatprep.subr.bf16.mxu1 %v3225_v0 }
 0x164   :  { %v471_v29 = vpop.permute.xlu1 %470  ;;  %v421_v34 = vpop.permute.xlu0 %420 }
 0x165   :  { %v476_v30 = vsel %vm122_vm2, %v471_v29, 0  ;;  %2791 = vmatmul.mubr.msk.bf16.vlgmr.msra.gmra.mxu0 %vm122_vm2, %v369_v26  ;;  %v426_v35 = vsel %vm122_vm2, %v421_v34, 0 }
 0x166   :  { %2801 = vmatpush3.bf16.xpose.msra.mxu0 %v476_v30  ;;  %2802 = vmatprep.mubr.msk.bf16.mxu0 %vm3226_vm0, %v3225_v0 }
 0x167   :  { %2812 = vmatprep.subr.bf16.mxu0 %v3225_v0 }
 0x168   :  { %v469_v33 = vpop.permute.xlu1 %468  ;;  %v419_v37 = vpop.permute.xlu0 %418 }
 0x169   :  { %2773 = vmatmul.mubr.msk.bf16.vlgmr.msra.gmra.mxu1 %vm122_vm2, %v219_v23 }
 0x16a   :  { %2783 = vmatpush3.bf16.xpose.msra.mxu1 %v326_v32  ;;  %2784 = vmatprep.mubr.msk.bf16.mxu1 %vm3226_vm0, %v3225_v0 }
 0x16b   :  { %2794 = vmatprep.subr.bf16.mxu1 %v3225_v0 }
 0x16c   :  { %v623_v36 = vpop.permute.xlu1 %622 }
 0x16d   :  { %2803 = vmatmul.mubr.msk.bf16.vlgmr.msra.gmra.mxu0 %vm122_vm2, %v469_v33  ;;  %v629_v38 = vsel %vm627_vm3, %v623_v36, 0 }
 0x16e   :  { %2814 = vmatprep.mubr.msk.bf16.mxu0 %vm3226_vm0, %v3225_v0 }
 0x171   :  { %2785 = vmatmul.mubr.msk.bf16.vlgmr.msra.gmra.mxu1 %vm122_vm2, %v319_v31 }
 0x172   :  { %2795 = vmatpush3.bf16.xpose.msra.mxu1 %v426_v35  ;;  %2796 = vmatprep.mubr.msk.bf16.mxu1 %vm3226_vm0, %v3225_v0 }
 0x173   :  { %2806 = vmatprep.subr.bf16.mxu1 %v3225_v0 }
 0x179   :  { %2797 = vmatmul.mubr.msk.bf16.vlgmr.msra.gmra.mxu1 %vm122_vm2, %v419_v37 }
 0x17a   :  { %2807 = vmatpush3.bf16.msra.mxu1 %v629_v38  ;;  %2808 = vmatprep.mubr.msk.bf16.mxu1 %vm3226_vm0, %v3225_v0 }
 0x17b   :  { %2818 = vmatprep.subr.bf16.mxu1 %v3225_v0 }
 0x219   :  { %v163_v39 = vpop.f32.mrf.mxu1 }
 0x21a   :  { %v518_v40 = vmul.f32 0.35355338, %v163_v39 }
 0x21b   :  { %v2762_v41 = vpop.f32.mrf.mxu1 }
 0x21c   :  { %v526_v42 = vsel %vm122_vm2, %v518_v40, -inf }
 0x21d   :  { %v312_v43 = vpop.f32.mrf.mxu0  ;;  %527 = vmax.xlane.f32.xlu0 %v526_v42  ;;  %v166_v44 = vpop.f32.mrf.mxu1 }
 0x21e   :  { %v523_v45 = vmul.f32 0.35355338, %v312_v43 }
 0x21f   :  { %v2763_v46 = vpop.f32.mrf.mxu1  ;;  %v2780_v47 = vpop.f32.mrf.mxu0 }
 0x220   :  { %v541_v48 = vsel %vm122_vm2, %v523_v45, -inf }
 0x221   :  { %v315_v49 = vpop.f32.mrf.mxu0  ;;  %542 = vmax.xlane.f32.xlu0 %v541_v48  ;;  %v212_v50 = vpop.f32.mrf.mxu1 }
 0x222   :  { %v522_v51 = vmul.f32 0.35355338, %v212_v50 }
 0x223   :  { %v2768_v52 = vpop.f32.mrf.mxu1  ;;  %v2781_v53 = vpop.f32.mrf.mxu0 }
 0x224   :  { %v538_v54 = vsel %vm122_vm2, %v522_v51, -inf }
 0x225   :  { %v412_v55 = vpop.f32.mrf.mxu0  ;;  %539 = vmax.xlane.f32.xlu1 %v538_v54  ;;  %v215_v56 = vpop.f32.mrf.mxu1 }
 0x226   :  { %v3407_v57 = vmul.f32 0.35355338, %v412_v55 }
 0x227   :  { %v2769_v58 = vpop.f32.mrf.mxu1  ;;  %v2792_v59 = vpop.f32.mrf.mxu0 }
 0x228   :  { %v544_v60 = vsel %vm122_vm2, %v3407_v57, -inf }
 0x229   :  { %v415_v61 = vpop.f32.mrf.mxu0  ;;  %545 = vmax.xlane.f32.xlu0 %v544_v60  ;;  %v262_v62 = vpop.f32.mrf.mxu1 }
 0x22a   :  { %v3411_v63 = vmul.f32 0.35355338, %v262_v62 }
 0x22b   :  { %v2774_v1 = vpop.f32.mrf.mxu1  ;;  %v2793_v2 = vpop.f32.mrf.mxu0 }
 0x22c   :  { %v529_v5 = vsel %vm122_vm2, %v3411_v63, -inf }
 0x22d   :  { %v512_v6 = vpop.f32.mrf.mxu0  ;;  %530 = vmax.xlane.f32.xlu0 %v529_v5  ;;  %v265_v7 = vpop.f32.mrf.mxu1 }
 0x22e   :  { %v3415_v8 = vmul.f32 0.35355338, %v512_v6 }
 0x22f   :  { %v2775_v9 = vpop.f32.mrf.mxu1  ;;  %v2804_v11 = vpop.f32.mrf.mxu0 }
 0x230   :  { %v547_v12 = vsel %vm122_vm2, %v3415_v8, -inf }
 0x231   :  { %v515_v13 = vpop.f32.mrf.mxu0  ;;  %548 = vmax.xlane.f32.xlu0 %v547_v12  ;;  %v362_v15 = vpop.f32.mrf.mxu1 }
 0x232   :  { %v520_v24 = vmul.f32 0.35355338, %v362_v15 }
 0x233   :  { %v2786_v16 = vpop.f32.mrf.mxu1  ;;  %v2805_v17 = vpop.f32.mrf.mxu0 }
 0x234   :  { %v532_v26 = vsel %vm122_vm2, %v520_v24, -inf }
 0x235   :  { %v365_v18 = vpop.f32.mrf.mxu1 }
 0x236   :  { %719 = vrot.lane.b32.xlu1 %v3326_v10, %s3234_s27 }
 0x237   :  { %v2787_v19 = vpop.f32.mrf.mxu1 }
 0x239   :  { %v462_v20 = vpop.f32.mrf.mxu1 }
 0x23a   :  { %v521_v25 = vmul.f32 0.35355338, %v462_v20 }
 0x23b   :  { %v2798_v21 = vpop.f32.mrf.mxu1 }
 0x23c   :  { %v535_v27 = vsel %vm122_vm2, %v521_v25, -inf }
 0x23d   :  { %v465_v22 = vpop.f32.mrf.mxu1 }
 0x23f   :  { %v2799_v23 = vpop.f32.mrf.mxu1 }
 0x247   :  { %671 = vrot.lane.b32.xlu0 %v3332_v14, %s3223_s30 }
 0x25a   :  { %533 = vmax.xlane.f32.xlu1 %v532_v26 }
 0x25e   :  { %536 = vmax.xlane.f32.xlu1 %v535_v27 }
 0x26f   :  { %767 = vrot.lane.b32.xlu1 %v3332_v14, %s3234_s27 }
 0x2a6   :  { %v528_v28 = vpop.xlane.xlu0 %527 }
 0x2a7   :  { %v550_v29 = vsub.f32 %v518_v40, %v528_v28 }
 0x2a9   :  { %v558_v30 = vmul.f32 1.442695, %v550_v29 }
 0x2aa   :  { %v543_v31 = vpop.xlane.xlu0 %542 }
 0x2ab   :  { %3080 = vpow2.f32 %v558_v30  ;;  %v555_v32 = vsub.f32 %v523_v45, %v543_v31 }
 0x2ad   :  { %v568_v33 = vmul.f32 1.442695, %v555_v32 }
 0x2ae   :  { %v540_v34 = vpop.xlane.xlu1 %539 }
 0x2af   :  { %3082 = vpow2.f32 %v568_v33  ;;  %v554_v35 = vsub.f32 %v522_v51, %v540_v34 }
 0x2b1   :  { %v566_v36 = vmul.f32 1.442695, %v554_v35 }
 0x2b2   :  { %v546_v37 = vpop.xlane.xlu0 %545  ;;  %v720_v51 = vpop.permute.xlu1 %719 }
 0x2b3   :  { %3084 = vpow2.f32 %v566_v36  ;;  %v556_v50 = vsub.f32 %v3407_v57, %v546_v37  ;;  %v725_v19 = vsel %vm627_vm3, %v720_v51, 0 }
 0x2b5   :  { %v570_v52 = vmul.f32 1.442695, %v556_v50 }
 0x2b6   :  { %v531_v38 = vpop.xlane.xlu0 %530 }
 0x2b7   :  { %v551_v48 = vsub.f32 %v3411_v63, %v531_v38 }
 0x2b8   :  { %v3081_v39 = vpop.eup %3080 }
 0x2b9   :  { %v574_v41 = vsel %vm122_vm2, %v3081_v39, 0.0  ;;  %v560_v49 = vmul.f32 1.442695, %v551_v48 }
 0x2ba   :  { %v549_v42 = vpop.xlane.xlu0 %548  ;;  %575 = vadd.xlane.f32.xlu1 %v574_v41 }
 0x2bb   :  { %3086 = vpow2.f32 %v560_v49  ;;  %v557_v53 = vsub.f32 %v3415_v8, %v549_v42 }
 0x2bc   :  { %v3426_v43 = vpop.eup %3082  ;;  %3088 = vpow2.f32 %v570_v52 }
 0x2bd   :  { %v589_v40 = vsel %vm122_vm2, %v3426_v43, 0.0  ;;  %v572_v56 = vmul.f32 1.442695, %v557_v53  ;;  %v3064_v53 = vld [vmem:[%s3854_s2 + $0x8] sm:$0xff]  }
 0x2be   :  { %590 = vadd.xlane.f32.xlu0 %v589_v40  ;;  %v672_v44 = vpop.permute.xlu0 %671 }
 0x2bf   :  { %v677_v45 = vsel %vm627_vm3, %v672_v44, 0 }
 0x2c0   :  { %v3085_v46 = vpop.eup %3084  ;;  %2813 = vmatpush3.bf16.msra.mxu0 %v677_v45 }
 0x2c1   :  { %v586_v47 = vsel %vm122_vm2, %v3085_v46, 0.0  ;;  %2824 = vmatprep.subr.bf16.mxu0 %v3225_v0 }
 0x2c2   :  { %587 = vadd.xlane.f32.xlu0 %v586_v47 }
 0x2c8   :  { %v3438_v62 = vpop.eup %3086 }
 0x2c9   :  { %v577_v57 = vsel %vm122_vm2, %v3438_v62, 0.0  ;;  %v3442_v63 = vpop.eup %3088 }
 0x2ca   :  { %v592_v2 = vsel %vm122_vm2, %v3442_v63, 0.0 }
 0x2cb   :  { %863 = vrot.lane.b32.xlu1 %v3332_v14, %s3235_s28 }
 0x2d8   :  { %815 = vrot.lane.b32.xlu0 %v3326_v10, %s3235_s28 }
 0x2e3   :  { %v534_v54 = vpop.xlane.xlu1 %533 }
 0x2e4   :  { %v552_v55 = vsub.f32 %v520_v24, %v534_v54 }
 0x2e6   :  { %v562_v58 = vmul.f32 1.442695, %v552_v55 }
 0x2e7   :  { %v537_v59 = vpop.xlane.xlu1 %536 }
 0x2e8   :  { %3090 = vpow2.f32 %v562_v58  ;;  %v553_v60 = vsub.f32 %v521_v25, %v537_v59 }
 0x2e9   :  { %3092 = vpow2.f32 %v572_v56 }
 0x2ea   :  { %v564_v61 = vmul.f32 1.442695, %v553_v60 }
 0x2eb   :  { %v768_v11 = vpop.permute.xlu1 %767 }
 0x2ec   :  { %3094 = vpow2.f32 %v564_v61  ;;  %v773_v22 = vsel %vm627_vm3, %v768_v11, 0 }
 0x2ef   :  { %578 = vadd.xlane.f32.xlu1 %v577_v57 }
 0x2f5   :  { %v3444_v1 = vpop.eup %3090 }
 0x2f6   :  { %v580_v5 = vsel %vm122_vm2, %v3444_v1, 0.0  ;;  %v3450_v6 = vpop.eup %3092 }
 0x2f7   :  { %593 = vadd.xlane.f32.xlu0 %v592_v2  ;;  %581 = vadd.xlane.f32.xlu1 %v580_v5  ;;  %v595_v8 = vsel %vm122_vm2, %v3450_v6, 0.0 }
 0x2f9   :  { %v3452_v7 = vpop.eup %3094 }
 0x2fa   :  { %v583_v9 = vsel %vm122_vm2, %v3452_v7, 0.0 }
 0x2fb   :  { %596 = vadd.xlane.f32.xlu0 %v595_v8  ;;  %584 = vadd.xlane.f32.xlu1 %v583_v9 }
 0x30c   :  { %959 = vrot.lane.b32.xlu1 %v3332_v14, %s3236_s29 }
 0x311   :  { %911 = vrot.lane.b32.xlu0 %v3326_v10, %s3236_s29 }
 0x315   :  { %1061 = vrot.lane.b32.xlu0 %v3064_v53, %s3237_s10 }
 0x343   :  { %v576_v12 = vpop.xlane.xlu1 %575 }
 0x344   :  { %3096 = vrcp.f32 %v576_v12 }
 0x347   :  { %v591_v13 = vpop.xlane.xlu0 %590  ;;  %v864_v24 = vpop.permute.xlu1 %863 }
 0x348   :  { %v869_v26 = vsel %vm627_vm3, %v864_v24, 0 }
 0x34b   :  { %v588_v15 = vpop.xlane.xlu0 %587 }
 0x34c   :  { %3098 = vrcp.f32 %v588_v15 }
 0x34d   :  { %3100 = vrcp.f32 %v591_v13 }
 0x34f   :  { %v816_v28 = vpop.permute.xlu0 %815 }
 0x350   :  { %v821_v36 = vsel %vm627_vm3, %v816_v28, 0 }
 0x351   :  { %v3097_v16 = vpop.eup %3096 }
 0x352   :  { %v599_v17 = vmul.f32 %v3097_v16, %v3081_v39 }
 0x354   :  { %v614_v18 = vpack.c.bf16 %v599_v17, %v599_v17 }
 0x356   :  { %2809 = vmatmul.mubr.msk.bf16.vlgmr.msra.gmra.mxu1 %vm122_vm2, %v614_v18 }
 0x357   :  { %2819 = vmatpush3.bf16.msra.mxu1 %v725_v19  ;;  %2820 = vmatprep.mubr.msk.bf16.mxu1 %vm3226_vm0, %v3225_v0  ;;  %v3065_v19 = vld [vmem:[%s3854_s2] sm:$0xff]  }
 0x358   :  { %2830 = vmatprep.subr.bf16.mxu1 %v3225_v0 }
 0x359   :  { %v3099_v10 = vpop.eup %3098 }
 0x35a   :  { %v607_v14 = vmul.f32 %v3099_v10, %v3085_v46  ;;  %v3101_v21 = vpop.eup %3100 }
 0x35b   :  { %v609_v23 = vmul.f32 %v3101_v21, %v3426_v43 }
 0x35c   :  { %v618_v20 = vpack.c.bf16 %v607_v14, %v607_v14 }
 0x35d   :  { %v619_v25 = vpack.c.bf16 %v609_v23, %v609_v23 }
 0x35e   :  { %2815 = vmatmul.mubr.msk.bf16.vlgmr.msra.gmra.mxu0 %vm122_vm2, %v618_v20 }
 0x35f   :  { %2825 = vmatpush3.bf16.msra.mxu0 %v773_v22  ;;  %2826 = vmatprep.mubr.msk.bf16.mxu0 %vm3226_vm0, %v3225_v0 }
 0x360   :  { %2836 = vmatprep.subr.bf16.mxu0 %v3225_v0 }
 0x366   :  { %2827 = vmatmul.mubr.msk.bf16.vlgmr.msra.gmra.mxu0 %vm122_vm2, %v619_v25 }
 0x367   :  { %2837 = vmatpush3.bf16.msra.mxu0 %v869_v26  ;;  %2838 = vmatprep.mubr.msk.bf16.mxu0 %vm3226_vm0, %v3225_v0 }
 0x368   :  { %2848 = vmatprep.subr.bf16.mxu0 %v3225_v0 }
 0x378   :  { %v579_v27 = vpop.xlane.xlu1 %578 }
 0x379   :  { %3102 = vrcp.f32 %v579_v27 }
 0x380   :  { %v594_v29 = vpop.xlane.xlu0 %593  ;;  %v582_v30 = vpop.xlane.xlu1 %581 }
 0x381   :  { %3104 = vrcp.f32 %v594_v29 }
 0x382   :  { %3106 = vrcp.f32 %v582_v30 }
 0x384   :  { %v597_v31 = vpop.xlane.xlu0 %596  ;;  %v585_v32 = vpop.xlane.xlu1 %584 }
 0x385   :  { %3108 = vrcp.f32 %v597_v31 }
 0x386   :  { %v3103_v33 = vpop.eup %3102  ;;  %3110 = vrcp.f32 %v585_v32 }
 0x387   :  { %v601_v34 = vmul.f32 %v3103_v33, %v3438_v62 }
 0x388   :  { %v960_v41 = vpop.permute.xlu1 %959  ;;  %v912_v43 = vpop.permute.xlu0 %911 }
 0x389   :  { %v615_v35 = vpack.c.bf16 %v601_v34, %v601_v34  ;;  %v965_v47 = vsel %vm627_vm3, %v960_v41, 0  ;;  %v917_v48 = vsel %vm627_vm3, %v912_v43, 0 }
 0x38b   :  { %2821 = vmatmul.mubr.msk.bf16.vlgmr.msra.gmra.mxu1 %vm122_vm2, %v615_v35 }
 0x38c   :  { %2831 = vmatpush3.bf16.msra.mxu1 %v821_v36  ;;  %2832 = vmatprep.mubr.msk.bf16.mxu1 %vm3226_vm0, %v3225_v0  ;;  %v1062_v5 = vpop.permute.xlu0 %1061 }
 0x38d   :  { %2842 = vmatprep.subr.bf16.mxu1 %v3225_v0 }
 0x38e   :  { %v3105_v37 = vpop.eup %3104 }
 0x38f   :  { %v3107_v38 = vpop.eup %3106  ;;  %v611_v39 = vmul.f32 %v3105_v37, %v3442_v63 }
 0x390   :  { %v603_v42 = vmul.f32 %v3107_v38, %v3444_v1 }
 0x391   :  { %v620_v40 = vpack.c.bf16 %v611_v39, %v611_v39 }
 0x392   :  { %v3109_v44 = vpop.eup %3108  ;;  %v616_v45 = vpack.c.bf16 %v603_v42, %v603_v42 }
 0x393   :  { %v3111_v46 = vpop.eup %3110  ;;  %2839 = vmatmul.mubr.msk.bf16.vlgmr.msra.gmra.mxu0 %vm122_vm2, %v620_v40  ;;  %v613_v49 = vmul.f32 %v3109_v44, %v3450_v6 }
 0x394   :  { %2833 = vmatmul.mubr.msk.bf16.vlgmr.msra.gmra.mxu1 %vm122_vm2, %v616_v45  ;;  %2849 = vmatpush3.bf16.msra.mxu0 %v965_v47  ;;  %v605_v50 = vmul.f32 %v3111_v46, %v3452_v7  ;;  %v2608_v47 = vld [vmem:[%s3858_s6 + $0x1] ss:$0 sm:$0xff] }
 0x395   :  { %2843 = vmatpush3.bf16.msra.mxu1 %v917_v48  ;;  %2844 = vmatprep.mubr.msk.bf16.mxu1 %vm3226_vm0, %v3225_v0  ;;  %v621_v51 = vpack.c.bf16 %v613_v49, %v613_v49 }
 0x396   :  { %2850 = vmatprep.mubr.msk.bf16.mxu0 %vm3226_vm0, %v3225_v0  ;;  %2854 = vmatprep.subr.bf16.mxu1 %v3225_v0  ;;  %v617_v52 = vpack.c.bf16 %v605_v50, %v605_v50 }
 0x397   :  { %2862 = vmatprep.subr.bf16.mxu0 %v3225_v0 }
 0x39b   :  { %2851 = vmatmul.mubr.msk.bf16.vlgmr.msra.gmra.mxu0 %vm122_vm2, %v621_v51 }
 0x39c   :  { %2845 = vmatmul.mubr.msk.bf16.vlgmr.msra.gmra.mxu1 %vm122_vm2, %v617_v52  ;;  %2866 = vmatprep.mubr.msk.bf16.mxu0 %vm3226_vm0, %v3225_v0 }
 0x39d   :  { %2858 = vmatprep.mubr.msk.bf16.mxu1 %vm3226_vm0, %v3225_v0  ;;  %2855 = vmatpush3.bf16.msra.mxu1 %v1062_v5 }
 0x39e   :  { %2856 = vmatprep.subr.bf16.mxu1 %v3225_v0 }
 0x416   :  { %v665_v54 = vpop.f32.mrf.mxu1 }
 0x418   :  { %v2810_v55 = vpop.f32.mrf.mxu1 }
 0x41a   :  { %v668_v56 = vpop.f32.mrf.mxu1 }
 0x41c   :  { %v2811_v58 = vpop.f32.mrf.mxu1 }
 0x41e   :  { %v713_v59 = vpop.f32.mrf.mxu0 }
 0x420   :  { %v2816_v60 = vpop.f32.mrf.mxu0 }
 0x422   :  { %v716_v61 = vpop.f32.mrf.mxu0 }
 0x424   :  { %v2817_v62 = vpop.f32.mrf.mxu0 }
 0x426   :  { %v809_v57 = vpop.f32.mrf.mxu0 }
 0x428   :  { %v2828_v63 = vpop.f32.mrf.mxu0 }
 0x42a   :  { %v812_v1 = vpop.f32.mrf.mxu0 }
 0x42c   :  { %v2829_v2 = vpop.f32.mrf.mxu0 }
 0x44b   :  { %v761_v6 = vpop.f32.mrf.mxu1 }
 0x44c   :  { %v3032_v7 = vpack.i.bf16 %v809_v57, %v761_v6 }
 0x44d   :  { %v2822_v8 = vpop.f32.mrf.mxu1 }
 0x44e   :  { %3033 = vrot.lane.b32.xlu1 %v3032_v7, %s3238_s11  ;;  %v47_v7 = vld [vmem:[%s3853_s1] sm:$0xff]  ;;  %v48_v8 = vld [vmem:[%s3853_s1 + $0x8] sm:$0xff] }
 0x44f   :  { %v764_v9 = vpop.f32.mrf.mxu1 }
 0x450   :  { %v1218_v9 = vpack.c.bf16 %v48_v8, %v47_v7 }
 0x451   :  { %v2823_v11 = vpop.f32.mrf.mxu1 }
 0x453   :  { %v905_v12 = vpop.f32.mrf.mxu0 }
 0x454   :  { %v857_v13 = vpop.f32.mrf.mxu1 }
 0x455   :  { %v3037_v15 = vpack.i.bf16 %v905_v12, %v857_v13  ;;  %v2840_v16 = vpop.f32.mrf.mxu0 }
 0x456   :  { %v2834_v17 = vpop.f32.mrf.mxu1 }
 0x457   :  { %3038 = vrot.lane.b32.xlu0 %v3037_v15, %s3239_s12  ;;  %v908_v18 = vpop.f32.mrf.mxu0 }
 0x458   :  { %v860_v10 = vpop.f32.mrf.mxu1  ;;  %v49_v18 = vld [vmem:[%s3853_s1 + $0x10] sm:$0xff] }
 0x459   :  { %v2841_v14 = vpop.f32.mrf.mxu0 }
 0x45a   :  { %v2835_v20 = vpop.f32.mrf.mxu1  ;;  %v1219_v14 = vpack.c.bf16 %v49_v18, %v49_v18 }
 0x45b   :  { %v1001_v21 = vpop.f32.mrf.mxu0  ;;  %1059 = vrot.lane.b32.xlu0 %v3065_v19, %s3237_s10 }
 0x45c   :  { %v953_v22 = vpop.f32.mrf.mxu1 }
 0x45d   :  { %v3042_v23 = vpack.i.bf16 %v1001_v21, %v953_v22  ;;  %v2852_v24 = vpop.f32.mrf.mxu0  ;;  %v2612_v22 = vld [vmem:[%s3858_s6 + $0x7] ss:$0 sm:$0xff] }
 0x45e   :  { %v2846_v25 = vpop.f32.mrf.mxu1 }
 0x45f   :  { %3043 = vrot.lane.b32.xlu1 %v3042_v23, %s3240_s14  ;;  %v1004_v26 = vpop.f32.mrf.mxu0 }
 0x460   :  { %v956_v27 = vpop.f32.mrf.mxu1  ;;  %v2613_v26 = vld [vmem:[%s3858_s6 + $0x8] ss:$0 sm:$0xff] }
 0x461   :  { %v2853_v28 = vpop.f32.mrf.mxu0 }
 0x462   :  { %v2847_v29 = vpop.f32.mrf.mxu1 }
 0x4c0   :  { %v3034_v31 = vpop.permute.xlu1 %3033 }
 0x4c1   :  { %v3036_v33 = vunpack.i.h.bf16 %v3034_v31  ;;  %v3035_v34 = vunpack.i.l.bf16 %v3034_v31 }
 0x4c3   :  { %v1032_v38 = vsel %vm122_vm2, %v713_v59, %v3036_v33  ;;  %v1031_v39 = vsel %vm122_vm2, %v665_v54, %v3035_v34  ;;  %v3066_v59 = vld [vmem:[%s3855_s3 + $0x8] sm:$0xff]  }
 0x4c4   :  { %2863 = vmatpush3.bf16.msra.mxu0 %v3066_v59 }
 0x4c5   :  { %2864 = vmatprep.subr.bf16.mxu0 %v3225_v0 }
 0x4c9   :  { %v3039_v30 = vpop.permute.xlu0 %3038 }
 0x4ca   :  { %v3041_v35 = vunpack.i.h.bf16 %v3039_v30  ;;  %v3040_v36 = vunpack.i.l.bf16 %v3039_v30 }
 0x4cc   :  { %v1035_v43 = vsel %vm1033_vm4, %v1032_v38, %v3041_v35  ;;  %v1034_v40 = vsel %vm1033_vm4, %v1031_v39, %v3040_v36 }
 0x4cd   :  { %v1060_v32 = vpop.permute.xlu0 %1059 }
 0x4ce   :  { %2857 = vmatpush3.bf16.msra.mxu1 %v1060_v32  ;;  %v2618_v32 = vld [vmem:[%s3858_s6 + $0x3] ss:$0 sm:$0xff] }
 0x4d1   :  { %v3044_v37 = vpop.permute.xlu1 %3043 }
 0x4d2   :  { %v3046_v41 = vunpack.i.h.bf16 %v3044_v37  ;;  %v3045_v42 = vunpack.i.l.bf16 %v3044_v37 }
 0x4d4   :  { %v1038_v44 = vsel %vm1036_vm5, %v1035_v43, %v3046_v41  ;;  %v1037_v45 = vsel %vm1036_vm5, %v1034_v40, %v3045_v42 }
 0x4d5   :  { %v1043_v46 = vpack.c.bf16 %v1038_v44, %v1037_v45 }
 0x4d7   :  { %2859 = vmatmul.mubr.msk.bf16.vlgmr.msra.gmra.mxu1 %vm72_vm1, %v1043_v46  ;;  %v2614_v46 = vld [vmem:[%s3858_s6 + $0x2] ss:$0 sm:$0xff] }
 0x4d8   :  { %2874 = vmatprep.mubr.msk.bf16.mxu1 %vm72_vm1, %v1218_v9 }
 0x597   :  { %v1102_v48 = vpop.f32.mrf.mxu1 }
 0x598   :  { %v1103_v49 = vadd.f32 %v2608_v47, %v1102_v48 }
 0x599   :  { %v2860_v50 = vpop.f32.mrf.mxu1 }
 0x59a   :  { %v1109_v51 = vadd.f32 %v1103_v49, %v3309_v3  ;;  %v3067_v3 = vld [vmem:[%s3855_s3] sm:$0xff]  }
 0x59b   :  { %v1105_v52 = vpop.f32.mrf.mxu1  ;;  %2865 = vmatpush3.bf16.msra.mxu0 %v3067_v3 }
 0x59c   :  { %v1106_v53 = vadd.f32 %v2608_v47, %v1105_v52  ;;  %v1113_v54 = vsel %vm72_vm1, %v1109_v51, 0.0  ;;  %2878 = vmatprep.subr.bf16.mxu0 %v3225_v0 }
 0x59d   :  { %1114 = vadd.xlane.f32.xlu1 %v1113_v54  ;;  %v2861_v55 = vpop.f32.mrf.mxu1 }
 0x59e   :  { %v1110_v56 = vadd.f32 %v1106_v53, %v3314_v4 }
 0x5a0   :  { %v1116_v58 = vsel %vm72_vm1, %v1110_v56, 0.0 }
 0x5a1   :  { %1117 = vadd.xlane.f32.xlu0 %v1116_v58 }
 0x626   :  { %v1115_v60 = vpop.xlane.xlu1 %1114 }
 0x627   :  { %v1120_v61 = vmul.f32 0.03125, %v1115_v60 }
 0x629   :  { %v1122_v4 = vsub.f32 %v1109_v51, %v1120_v61 }
 0x62a   :  { %v1118_v62 = vpop.xlane.xlu0 %1117 }
 0x62b   :  { %v1121_v57 = vmul.f32 0.03125, %v1118_v62  ;;  %v1124_v63 = vmul.f32 %v1122_v4, %v1122_v4 }
 0x62d   :  { %v1123_v1 = vsub.f32 %v1110_v56, %v1121_v57  ;;  %v1126_v2 = vsel %vm72_vm1, %v1124_v63, 0.0 }
 0x62e   :  { %1127 = vadd.xlane.f32.xlu0 %v1126_v2 }
 0x62f   :  { %v1125_v5 = vmul.f32 %v1123_v1, %v1123_v1 }
 0x631   :  { %v1129_v6 = vsel %vm72_vm1, %v1125_v5, 0.0 }
 0x632   :  { %1130 = vadd.xlane.f32.xlu1 %v1129_v6 }
 0x643   :  { %1225 = vrot.lane.b32.xlu1 %v3067_v3, %s3228_s21 }
 0x644   :  { %1227 = vrot.lane.b32.xlu0 %v3066_v59, %s3228_s21 }
 0x6b7   :  { %v1128_v11 = vpop.xlane.xlu0 %1127 }
 0x6b8   :  { %v1132_v12 = vmul.f32 0.03125, %v1128_v11 }
 0x6ba   :  { %v1134_v13 = vadd.f32 1e-05, %v1132_v12 }
 0x6bb   :  { %v1131_v15 = vpop.xlane.xlu1 %1130  ;;  %v1228_v16 = vpop.permute.xlu0 %1227 }
 0x6bc   :  { %3112 = vrsqrt.f32 %v1134_v13  ;;  %v1133_v17 = vmul.f32 0.03125, %v1131_v15  ;;  %2870 = vmatprep.subr.bf16.mxu1 %v1228_v16 }
 0x6bd   :  { %2871 = vmatpush3.bf16.msra.mxu1 %v1228_v16 }
 0x6be   :  { %v1135_v19 = vadd.f32 1e-05, %v1133_v17 }
 0x6bf   :  { %v1226_v10 = vpop.permute.xlu1 %1225 }
 0x6c0   :  { %3114 = vrsqrt.f32 %v1135_v19  ;;  %2872 = vmatprep.subr.bf16.mxu1 %v1226_v10 }
 0x6c1   :  { %2873 = vmatpush3.bf16.msra.mxu1 %v1226_v10 }
 0x6c2   :  { %2884 = vmatprep.subr.bf16.mxu1 %v3225_v0 }
 0x6c4   :  { %2875 = vmatmul.mubr.msk.bf16.vlgmr.msra.gmra.mxu1 %vm72_vm1, %v1219_v14 }
 0x6c5   :  { %2886 = vmatprep.mubr.msk.bf16.mxu1 %vm3226_vm0, %v3225_v0 }
 0x6c9   :  { %v3113_v20 = vpop.eup %3112 }
 0x6ca   :  { %v1138_v21 = vmul.f32 %v3113_v20, %v1122_v4 }
 0x6cc   :  { %v1144_v25 = vmul.f32 %v2612_v22, %v1138_v21 }
 0x6cd   :  { %v3115_v23 = vpop.eup %3114 }
 0x6ce   :  { %v1139_v24 = vmul.f32 %v3115_v23, %v1123_v1  ;;  %v3560_v28 = vadd.f32 %v2613_v26, %v1144_v25 }
 0x6d0   :  { %v1145_v27 = vmul.f32 %v2612_v22, %v1139_v24 }
 0x6d2   :  { %v3562_v29 = vadd.f32 %v2613_v26, %v1145_v27 }
 0x6d4   :  { %v1156_v30 = vpack.c.bf16 %v3562_v29, %v3560_v28 }
 0x6d6   :  { %2867 = vmatmul.mubr.msk.bf16.vlgmr.msra.gmra.mxu0 %vm72_vm1, %v1156_v30 }
 0x6d7   :  { %2880 = vmatprep.mubr.msk.bf16.mxu0 %vm3226_vm0, %v3225_v0 }
 0x784   :  { %v2876_v31 = vpop.f32.mrf.mxu1 }
 0x785   :  { %v1280_v35 = vadd.f32 %v2876_v31, %v2618_v32 }
 0x786   :  { %v1271_v33 = vpop.f32.mrf.mxu1 }
 0x787   :  { %v1272_v37 = vadd.f32 %v2618_v32, %v1271_v33  ;;  %v1288_v39 = vrot.slane %v1280_v35, 4 }
 0x788   :  { %v2877_v34 = vpop.f32.mrf.mxu1 }
 0x78a   :  { %v1274_v36 = vpop.f32.mrf.mxu1 }
 0x78b   :  { %v1275_v38 = vadd.f32 %v2618_v32, %v1274_v36 }
 0x78d   :  { %v1287_v41 = vrot.slane %v1275_v38, 4  ;;  %v3572_v42 = vpack.c.bf16 %v1275_v38, %v1272_v37 }
 0x78f   :  { %v1289_v43 = vsel %vm627_vm3, %v1287_v41, %v1288_v39  ;;  %1392 = vrot.lane.b32.xlu1 %v3572_v42, %s3229_s22  ;;  %v1300_v40 = vsel %vm122_vm2, %v3572_v42, 0 }
 0x790   :  { %v3579_v44 = vpack.c.bf16 %v1288_v39, %v1289_v43  ;;  %2879 = vmatpush3.bf16.xpose.msra.mxu0 %v1300_v40 }
 0x791   :  { %2890 = vmatprep.subr.bf16.mxu0 %v3225_v0 }
 0x792   :  { %1444 = vrot.lane.b32.xlu0 %v3579_v44, %s3229_s22  ;;  %v1346_v45 = vsel %vm122_vm2, %v3579_v44, 0 }
 0x793   :  { %2885 = vmatpush3.bf16.xpose.msra.mxu1 %v1346_v45  ;;  %1494 = vrot.lane.b32.xlu1 %v3572_v42, %s3231_s24 }
 0x794   :  { %2896 = vmatprep.subr.bf16.mxu1 %v3225_v0 }
 0x796   :  { %v1211_v47 = vpop.f32.mrf.mxu0  ;;  %1544 = vrot.lane.b32.xlu0 %v3579_v44, %s3231_s24 }
 0x797   :  { %v1212_v48 = vadd.f32 %v2614_v46, %v1211_v47 }
 0x798   :  { %v2868_v49 = vpop.f32.mrf.mxu0 }
 0x799   :  { %v1292_v50 = vpack.c.bf16 %v1212_v48, %v1212_v48 }
 0x79a   :  { %v1214_v51 = vpop.f32.mrf.mxu0 }
 0x79b   :  { %v1215_v52 = vadd.f32 %v2614_v46, %v1214_v51  ;;  %1389 = vrot.lane.b32.xlu1 %v1292_v50, %s3229_s22  ;;  %2881 = vmatmul.mubr.msk.bf16.vlgmr.msra.gmra.mxu0 %vm122_vm2, %v1292_v50 }
 0x79c   :  { %v2869_v53 = vpop.f32.mrf.mxu0  ;;  %2892 = vmatprep.mubr.msk.bf16.mxu0 %vm3226_vm0, %v3225_v0 }
 0x79d   :  { %v1293_v54 = vpack.c.bf16 %v1215_v52, %v1215_v52 }
 0x79f   :  { %1441 = vrot.lane.b32.xlu0 %v1293_v54, %s3229_s22  ;;  %2887 = vmatmul.mubr.msk.bf16.vlgmr.msra.gmra.mxu1 %vm122_vm2, %v1293_v54 }
 0x7a0   :  { %1492 = vrot.lane.b32.xlu1 %v1292_v50, %s3231_s24  ;;  %2898 = vmatprep.mubr.msk.bf16.mxu1 %vm3226_vm0, %v3225_v0 }
 0x7a3   :  { %1542 = vrot.lane.b32.xlu0 %v1293_v54, %s3231_s24 }
 0x7a4   :  { %1594 = vrot.lane.b32.xlu1 %v3572_v42, %s3233_s26 }
 0x7a7   :  { %1644 = vrot.lane.b32.xlu0 %v3579_v44, %s3233_s26 }
 0x7a8   :  { %1592 = vrot.lane.b32.xlu1 %v1292_v50, %s3233_s26 }
 0x7ab   :  { %1642 = vrot.lane.b32.xlu0 %v1293_v54, %s3233_s26 }
 0x7ac   :  { %1846 = vrot.lane.b32.xlu1 %v3579_v44, %s3228_s21 }
 0x7af   :  { %1797 = vrot.lane.b32.xlu0 %v3572_v42, %s3228_s21 }
 0x801   :  { %v1393_v55 = vpop.permute.xlu1 %1392 }
 0x802   :  { %v1398_v56 = vsel %vm122_vm2, %v1393_v55, 0 }
 0x803   :  { %2891 = vmatpush3.bf16.xpose.msra.mxu0 %v1398_v56 }
 0x804   :  { %v1445_v58 = vpop.permute.xlu0 %1444  ;;  %2902 = vmatprep.subr.bf16.mxu0 %v3225_v0 }
 0x805   :  { %v1450_v59 = vsel %vm122_vm2, %v1445_v58, 0  ;;  %v1495_v3 = vpop.permute.xlu1 %1494 }
 0x806   :  { %2897 = vmatpush3.bf16.xpose.msra.mxu1 %v1450_v59  ;;  %v1500_v4 = vsel %vm122_vm2, %v1495_v3, 0 }
 0x807   :  { %2908 = vmatprep.subr.bf16.mxu1 %v3225_v0 }
 0x808   :  { %v1545_v60 = vpop.permute.xlu0 %1544 }
 0x809   :  { %v1550_v57 = vsel %vm122_vm2, %v1545_v60, 0 }
 0x80d   :  { %v1390_v61 = vpop.permute.xlu1 %1389 }
 0x80e   :  { %2893 = vmatmul.mubr.msk.bf16.vlgmr.msra.gmra.mxu0 %vm122_vm2, %v1390_v61 }
 0x80f   :  { %2903 = vmatpush3.bf16.xpose.msra.mxu0 %v1500_v4  ;;  %2904 = vmatprep.mubr.msk.bf16.mxu0 %vm3226_vm0, %v3225_v0 }
 0x810   :  { %2914 = vmatprep.subr.bf16.mxu0 %v3225_v0 }
 0x811   :  { %v1442_v62 = vpop.permute.xlu0 %1441 }
 0x812   :  { %v1493_v63 = vpop.permute.xlu1 %1492  ;;  %2899 = vmatmul.mubr.msk.bf16.vlgmr.msra.gmra.mxu1 %vm122_vm2, %v1442_v62 }
 0x813   :  { %2909 = vmatpush3.bf16.xpose.msra.mxu1 %v1550_v57  ;;  %2910 = vmatprep.mubr.msk.bf16.mxu1 %vm3226_vm0, %v3225_v0 }
 0x814   :  { %2920 = vmatprep.subr.bf16.mxu1 %v3225_v0 }
 0x815   :  { %v1543_v1 = vpop.permute.xlu0 %1542 }
 0x816   :  { %v1595_v2 = vpop.permute.xlu1 %1594  ;;  %2905 = vmatmul.mubr.msk.bf16.vlgmr.msra.gmra.mxu0 %vm122_vm2, %v1493_v63 }
 0x817   :  { %v1600_v5 = vsel %vm122_vm2, %v1595_v2, 0  ;;  %2916 = vmatprep.mubr.msk.bf16.mxu0 %vm3226_vm0, %v3225_v0 }
 0x818   :  { %2915 = vmatpush3.bf16.xpose.msra.mxu0 %v1600_v5 }
 0x819   :  { %v1645_v6 = vpop.permute.xlu0 %1644  ;;  %2926 = vmatprep.subr.bf16.mxu0 %v3225_v0 }
 0x81a   :  { %v1650_v7 = vsel %vm122_vm2, %v1645_v6, 0  ;;  %v1593_v8 = vpop.permute.xlu1 %1592  ;;  %2911 = vmatmul.mubr.msk.bf16.vlgmr.msra.gmra.mxu1 %vm122_vm2, %v1543_v1 }
 0x81b   :  { %2921 = vmatpush3.bf16.xpose.msra.mxu1 %v1650_v7  ;;  %2922 = vmatprep.mubr.msk.bf16.mxu1 %vm3226_vm0, %v3225_v0 }
 0x81c   :  { %2932 = vmatprep.subr.bf16.mxu1 %v3225_v0 }
 0x81d   :  { %v1643_v9 = vpop.permute.xlu0 %1642 }
 0x81e   :  { %v1847_v11 = vpop.permute.xlu1 %1846 }
 0x81f   :  { %2917 = vmatmul.mubr.msk.bf16.vlgmr.msra.gmra.mxu0 %vm122_vm2, %v1593_v8  ;;  %v1852_v13 = vsel %vm1802_vm6, %v1847_v11, 0 }
 0x820   :  { %2928 = vmatprep.mubr.msk.bf16.mxu0 %vm3226_vm0, %v3225_v0 }
 0x821   :  { %v1798_v12 = vpop.permute.xlu0 %1797 }
 0x822   :  { %v1804_v15 = vsel %vm1802_vm6, %v1798_v12, 0  ;;  %2923 = vmatmul.mubr.msk.bf16.vlgmr.msra.gmra.mxu1 %vm122_vm2, %v1643_v9 }
 0x823   :  { %2927 = vmatpush3.bf16.msra.mxu0 %v1804_v15  ;;  %2933 = vmatpush3.bf16.msra.mxu1 %v1852_v13 }
 0x824   :  { %2938 = vmatprep.subr.bf16.mxu0 %v3225_v0  ;;  %2934 = vmatprep.mubr.msk.bf16.mxu1 %vm3226_vm0, %v3225_v0 }
 0x825   :  { %2944 = vmatprep.subr.bf16.mxu1 %v3225_v0 }
 0x85b   :  { %v1336_v16 = vpop.f32.mrf.mxu0 }
 0x85c   :  { %v1692_v17 = vmul.f32 0.35355338, %v1336_v16 }
 0x85d   :  { %v2882_v18 = vpop.f32.mrf.mxu0 }
 0x85e   :  { %v1701_v19 = vsel %vm1700_vm7, %v1692_v17, -inf }
 0x85f   :  { %v1382_v10 = vpop.f32.mrf.mxu1  ;;  %1702 = vmax.xlane.f32.xlu1 %v1701_v19  ;;  %v1339_v14 = vpop.f32.mrf.mxu0 }
 0x860   :  { %v1696_v20 = vmul.f32 0.35355338, %v1382_v10 }
 0x861   :  { %v2883_v21 = vpop.f32.mrf.mxu0  ;;  %v2888_v22 = vpop.f32.mrf.mxu1 }
 0x862   :  { %v1713_v23 = vsel %vm1700_vm7, %v1696_v20, -inf }
 0x863   :  { %v1385_v24 = vpop.f32.mrf.mxu1  ;;  %1714 = vmax.xlane.f32.xlu0 %v1713_v23 }
 0x865   :  { %v2889_v25 = vpop.f32.mrf.mxu1 }
 0x8ce   :  { %v1434_v26 = vpop.f32.mrf.mxu0 }
 0x8cf   :  { %v1693_v27 = vmul.f32 0.35355338, %v1434_v26 }
 0x8d0   :  { %v2894_v30 = vpop.f32.mrf.mxu0 }
 0x8d1   :  { %v1704_v31 = vsel %vm1700_vm7, %v1693_v27, -inf }
 0x8d2   :  { %v1486_v32 = vpop.f32.mrf.mxu1  ;;  %1705 = vmax.xlane.f32.xlu0 %v1704_v31  ;;  %v1437_v33 = vpop.f32.mrf.mxu0 }
 0x8d3   :  { %v1697_v34 = vmul.f32 0.35355338, %v1486_v32 }
 0x8d4   :  { %v2895_v35 = vpop.f32.mrf.mxu0  ;;  %v2900_v36 = vpop.f32.mrf.mxu1 }
 0x8d5   :  { %v1716_v37 = vsel %vm1700_vm7, %v1697_v34, -inf }
 0x8d6   :  { %v1489_v38 = vpop.f32.mrf.mxu1  ;;  %1717 = vmax.xlane.f32.xlu1 %v1716_v37  ;;  %v1536_v39 = vpop.f32.mrf.mxu0 }
 0x8d7   :  { %v3652_v41 = vmul.f32 0.35355338, %v1536_v39 }
 0x8d8   :  { %v2901_v43 = vpop.f32.mrf.mxu1  ;;  %v2906_v40 = vpop.f32.mrf.mxu0 }
 0x8d9   :  { %v1707_v45 = vsel %vm1700_vm7, %v3652_v41, -inf }
 0x8da   :  { %v1586_v46 = vpop.f32.mrf.mxu1  ;;  %1708 = vmax.xlane.f32.xlu0 %v1707_v45  ;;  %v1539_v47 = vpop.f32.mrf.mxu0 }
 0x8db   :  { %v1698_v48 = vmul.f32 0.35355338, %v1586_v46 }
 0x8dc   :  { %v2907_v49 = vpop.f32.mrf.mxu0  ;;  %v2912_v50 = vpop.f32.mrf.mxu1 }
 0x8dd   :  { %v1719_v51 = vsel %vm1700_vm7, %v1698_v48, -inf }
 0x8de   :  { %v1589_v52 = vpop.f32.mrf.mxu1  ;;  %1720 = vmax.xlane.f32.xlu1 %v1719_v51 }
 0x8df   :  { %v1636_v53 = vpop.f32.mrf.mxu0 }
 0x8e0   :  { %v3657_v54 = vmul.f32 0.35355338, %v1636_v53  ;;  %v2913_v55 = vpop.f32.mrf.mxu1 }
 0x8e1   :  { %v2918_v56 = vpop.f32.mrf.mxu0 }
 0x8e2   :  { %v1686_v58 = vpop.f32.mrf.mxu1  ;;  %v1710_v59 = vsel %vm1700_vm7, %v3657_v54, -inf }
 0x8e3   :  { %v1699_v3 = vmul.f32 0.35355338, %v1686_v58  ;;  %1711 = vmax.xlane.f32.xlu0 %v1710_v59  ;;  %v1639_v60 = vpop.f32.mrf.mxu0 }
 0x8e4   :  { %v2924_v61 = vpop.f32.mrf.mxu1 }
 0x8e5   :  { %v2919_v4 = vpop.f32.mrf.mxu0  ;;  %v1722_v62 = vsel %vm1700_vm7, %v1699_v3, -inf }
 0x8e6   :  { %v1689_v57 = vpop.f32.mrf.mxu1  ;;  %1723 = vmax.xlane.f32.xlu1 %v1722_v62 }
 0x8e8   :  { %v2925_v63 = vpop.f32.mrf.mxu1  ;;  %v1703_v1 = vpop.xlane.xlu1 %1702 }
 0x8e9   :  { %v1725_v2 = vsub.f32 %v1692_v17, %v1703_v1 }
 0x8eb   :  { %v1733_v7 = vmul.f32 1.442695, %v1725_v2 }
 0x8ec   :  { %v1715_v5 = vpop.xlane.xlu0 %1714 }
 0x8ed   :  { %v1729_v6 = vsub.f32 %v1696_v20, %v1715_v5  ;;  %3116 = vpow2.f32 %v1733_v7 }
 0x8ef   :  { %v1741_v8 = vmul.f32 1.442695, %v1729_v6 }
 0x8f1   :  { %3118 = vpow2.f32 %v1741_v8 }
 0x8f7   :  { %1894 = vrot.lane.b32.xlu1 %v3572_v42, %s3227_s0 }
 0x8f9   :  { %1942 = vrot.lane.b32.xlu0 %v3579_v44, %s3227_s0 }
 0x8fa   :  { %v3117_v9 = vpop.eup %3116 }
 0x8fb   :  { %v1749_v12 = vsel %vm1700_vm7, %v3117_v9, 0.0 }
 0x8fe   :  { %v3119_v11 = vpop.eup %3118 }
 0x8ff   :  { %v1761_v13 = vsel %vm1700_vm7, %v3119_v11, 0.0 }
 0x918   :  { %1750 = vadd.xlane.f32.xlu0 %v1749_v12 }
 0x91b   :  { %1762 = vadd.xlane.f32.xlu1 %v1761_v13 }
 0x92c   :  { %1990 = vrot.lane.b32.xlu1 %v3572_v42, %s3230_s23 }
 0x95b   :  { %v1706_v15 = vpop.xlane.xlu0 %1705 }
 0x95c   :  { %v1726_v16 = vsub.f32 %v1693_v27, %v1706_v15 }
 0x95e   :  { %v1735_v17 = vmul.f32 1.442695, %v1726_v16 }
 0x95f   :  { %v1718_v18 = vpop.xlane.xlu1 %1717 }
 0x960   :  { %3120 = vpow2.f32 %v1735_v17  ;;  %v1730_v19 = vsub.f32 %v1697_v34, %v1718_v18 }
 0x962   :  { %v1743_v10 = vmul.f32 1.442695, %v1730_v19 }
 0x963   :  { %v1709_v35 = vpop.xlane.xlu0 %1708 }
 0x964   :  { %3122 = vpow2.f32 %v1743_v10  ;;  %v1727_v36 = vsub.f32 %v3652_v41, %v1709_v35 }
 0x966   :  { %v1737_v38 = vmul.f32 1.442695, %v1727_v36  ;;  %v3068_v36 = vld [vmem:[%s3855_s3 + $0x8] sm:$0xff]  }
 0x967   :  { %v1721_v14 = vpop.xlane.xlu1 %1720 }
 0x968   :  { %v1731_v20 = vsub.f32 %v1698_v48, %v1721_v14 }
 0x96a   :  { %v1745_v21 = vmul.f32 1.442695, %v1731_v20 }
 0x96c   :  { %3124 = vpow2.f32 %v1745_v21  ;;  %v1712_v37 = vpop.xlane.xlu0 %1711 }
 0x96d   :  { %v3670_v22 = vpop.eup %3120  ;;  %v1728_v39 = vsub.f32 %v3657_v54, %v1712_v37 }
 0x96e   :  { %v1752_v23 = vsel %vm1700_vm7, %v3670_v22, 0.0 }
 0x96f   :  { %v1724_v24 = vpop.xlane.xlu1 %1723  ;;  %1753 = vadd.xlane.f32.xlu0 %v1752_v23  ;;  %v1739_v43 = vmul.f32 1.442695, %v1728_v39 }
 0x970   :  { %v1732_v25 = vsub.f32 %v1699_v3, %v1724_v24  ;;  %v1943_v40 = vpop.permute.xlu0 %1942 }
 0x971   :  { %v3674_v26 = vpop.eup %3122  ;;  %v1948_v58 = vsel %vm1802_vm6, %v1943_v40, 0 }
 0x972   :  { %v1747_v27 = vmul.f32 1.442695, %v1732_v25  ;;  %v1764_v30 = vsel %vm1700_vm7, %v3674_v26, 0.0 }
 0x973   :  { %1765 = vadd.xlane.f32.xlu1 %v1764_v30  ;;  %v1895_v46 = vpop.permute.xlu1 %1894 }
 0x974   :  { %3126 = vpow2.f32 %v1747_v27  ;;  %v1900_v55 = vsel %vm1802_vm6, %v1895_v46, 0 }
 0x975   :  { %3128 = vpow2.f32 %v1737_v38 }
 0x976   :  { %3130 = vpow2.f32 %v1739_v43 }
 0x979   :  { %v3678_v31 = vpop.eup %3124 }
 0x97a   :  { %v1767_v32 = vsel %vm1700_vm7, %v3678_v31, 0.0 }
 0x97b   :  { %1768 = vadd.xlane.f32.xlu1 %v1767_v32 }
 0x981   :  { %v3682_v33 = vpop.eup %3126 }
 0x982   :  { %v1770_v34 = vsel %vm1700_vm7, %v3682_v33, 0.0  ;;  %v3692_v45 = vpop.eup %3128 }
 0x983   :  { %1771 = vadd.xlane.f32.xlu1 %v1770_v34  ;;  %v1755_v48 = vsel %vm1700_vm7, %v3692_v45, 0.0  ;;  %v3696_v41 = vpop.eup %3130 }
 0x984   :  { %v1758_v50 = vsel %vm1700_vm7, %v3696_v41, 0.0 }
 0x985   :  { %2038 = vrot.lane.b32.xlu0 %v3579_v44, %s3230_s23 }
 0x994   :  { %2086 = vrot.lane.b32.xlu1 %v3572_v42, %s3232_s25 }
 0x998   :  { %2234 = vrot.lane.b32.xlu1 %v3068_v36, %s3237_s10 }
 0x9a1   :  { %v1751_v47 = vpop.xlane.xlu0 %1750 }
 0x9a2   :  { %3132 = vrcp.f32 %v1751_v47 }
 0x9a4   :  { %v1763_v49 = vpop.xlane.xlu1 %1762  ;;  %1756 = vadd.xlane.f32.xlu0 %v1755_v48 }
 0x9a5   :  { %3134 = vrcp.f32 %v1763_v49 }
 0x9a8   :  { %1759 = vadd.xlane.f32.xlu0 %v1758_v50  ;;  %v1991_v59 = vpop.permute.xlu1 %1990 }
 0x9a9   :  { %v1996_v1 = vsel %vm1802_vm6, %v1991_v59, 0 }
 0x9af   :  { %v3133_v42 = vpop.eup %3132 }
 0x9b0   :  { %v1774_v51 = vmul.f32 %v3133_v42, %v3117_v9 }
 0x9b2   :  { %v3135_v52 = vpop.eup %3134  ;;  %v1789_v53 = vpack.c.bf16 %v1774_v51, %v1774_v51  ;;  %2547 = vst.msk [vmem:[#allocation6] sm:$0xff] %vm1700_vm7, %v1774_v51 }
 0x9b3   :  { %v1782_v54 = vmul.f32 %v3135_v52, %v3119_v11 }
 0x9b4   :  { %2929 = vmatmul.mubr.msk.bf16.vlgmr.msra.gmra.mxu0 %vm1700_vm7, %v1789_v53 }
 0x9b5   :  { %2939 = vmatpush3.bf16.msra.mxu0 %v1900_v55  ;;  %v1793_v56 = vpack.c.bf16 %v1782_v54, %v1782_v54  ;;  %2551 = vst.msk [vmem:[#allocation6 + $0x20] sm:$0xff] %vm1700_vm7, %v1782_v54  ;;  %2940 = vmatprep.mubr.msk.bf16.mxu0 %vm3226_vm0, %v3225_v0 }
 0x9b6   :  { %2950 = vmatprep.subr.bf16.mxu0 %v3225_v0 }
 0x9b7   :  { %2935 = vmatmul.mubr.msk.bf16.vlgmr.msra.gmra.mxu1 %vm1700_vm7, %v1793_v56 }
 0x9b8   :  { %2945 = vmatpush3.bf16.msra.mxu1 %v1948_v58  ;;  %2946 = vmatprep.mubr.msk.bf16.mxu1 %vm3226_vm0, %v3225_v0 }
 0x9b9   :  { %2956 = vmatprep.subr.bf16.mxu1 %v3225_v0 }
 0x9be   :  { %2134 = vrot.lane.b32.xlu0 %v3579_v44, %s3232_s25 }
 0x9f8   :  { %v1754_v3 = vpop.xlane.xlu0 %1753 }
 0x9f9   :  { %3136 = vrcp.f32 %v1754_v3  ;;  %v3069_v3 = vld [vmem:[%s3855_s3] sm:$0xff]  }
 0x9fc   :  { %v1766_v60 = vpop.xlane.xlu1 %1765  ;;  %v2039_v2 = vpop.permute.xlu0 %2038 }
 0x9fd   :  { %3138 = vrcp.f32 %v1766_v60  ;;  %v2044_v7 = vsel %vm1802_vm6, %v2039_v2, 0 }
 0xa04   :  { %v1769_v61 = vpop.xlane.xlu1 %1768 }
 0xa05   :  { %3140 = vrcp.f32 %v1769_v61 }
 0xa06   :  { %v3137_v4 = vpop.eup %3136 }
 0xa07   :  { %v1776_v62 = vmul.f32 %v3137_v4, %v3670_v22 }
 0xa09   :  { %v1790_v57 = vpack.c.bf16 %v1776_v62, %v1776_v62  ;;  %2548 = vst.msk [vmem:[#allocation6 + $0x8] sm:$0xff] %vm1700_vm7, %v1776_v62 }
 0xa0a   :  { %v3139_v63 = vpop.eup %3138 }
 0xa0b   :  { %2941 = vmatmul.mubr.msk.bf16.vlgmr.msra.gmra.mxu0 %vm1700_vm7, %v1790_v57  ;;  %v1784_v44 = vmul.f32 %v3139_v63, %v3674_v26 }
 0xa0c   :  { %2951 = vmatpush3.bf16.msra.mxu0 %v1996_v1  ;;  %v1772_v5 = vpop.xlane.xlu1 %1771  ;;  %2952 = vmatprep.mubr.msk.bf16.mxu0 %vm3226_vm0, %v3225_v0 }
 0xa0d   :  { %3142 = vrcp.f32 %v1772_v5  ;;  %v1794_v6 = vpack.c.bf16 %v1784_v44, %v1784_v44  ;;  %2552 = vst.msk [vmem:[#allocation6 + $0x28] sm:$0xff] %vm1700_vm7, %v1784_v44  ;;  %2962 = vmatprep.subr.bf16.mxu0 %v3225_v0 }
 0xa0f   :  { %2947 = vmatmul.mubr.msk.bf16.vlgmr.msra.gmra.mxu1 %vm1700_vm7, %v1794_v6 }
 0xa10   :  { %2957 = vmatpush3.bf16.msra.mxu1 %v2044_v7  ;;  %2958 = vmatprep.mubr.msk.bf16.mxu1 %vm3226_vm0, %v3225_v0  ;;  %v2087_v20 = vpop.permute.xlu1 %2086 }
 0xa11   :  { %2968 = vmatprep.subr.bf16.mxu1 %v3225_v0  ;;  %v2092_v23 = vsel %vm1802_vm6, %v2087_v20, 0  ;;  %v2637_v20 = vld [vmem:[%s3858_s6 + $0x4] ss:$0 sm:$0xff] }
 0xa12   :  { %v3141_v8 = vpop.eup %3140 }
 0xa13   :  { %v1786_v9 = vmul.f32 %v3141_v8, %v3678_v31 }
 0xa14   :  { %v2235_v51 = vpop.permute.xlu1 %2234 }
 0xa15   :  { %v1795_v11 = vpack.c.bf16 %v1786_v9, %v1786_v9  ;;  %2553 = vst.msk [vmem:[#allocation6 + $0x30] sm:$0xff] %vm1700_vm7, %v1786_v9 }
 0xa17   :  { %2959 = vmatmul.mubr.msk.bf16.vlgmr.msra.gmra.mxu1 %vm1700_vm7, %v1795_v11 }
 0xa18   :  { %2970 = vmatprep.mubr.msk.bf16.mxu1 %vm3226_vm0, %v3225_v0 }
 0xa1a   :  { %v3143_v12 = vpop.eup %3142 }
 0xa1b   :  { %v1788_v13 = vmul.f32 %v3143_v12, %v3682_v33 }
 0xa1d   :  { %2554 = vst.msk [vmem:[#allocation6 + $0x38] sm:$0xff] %vm1700_vm7, %v1788_v13  ;;  %v1796_v19 = vpack.c.bf16 %v1788_v13, %v1788_v13 }
 0xa2d   :  { %v1757_v15 = vpop.xlane.xlu0 %1756 }
 0xa2e   :  { %3144 = vrcp.f32 %v1757_v15 }
 0xa31   :  { %v1760_v16 = vpop.xlane.xlu0 %1759 }
 0xa32   :  { %3146 = vrcp.f32 %v1760_v16 }
 0xa35   :  { %v2135_v17 = vpop.permute.xlu0 %2134 }
 0xa36   :  { %v2140_v18 = vsel %vm1802_vm6, %v2135_v17, 0 }
 0xa37   :  { %2969 = vmatpush3.bf16.msra.mxu1 %v2140_v18 }
 0xa38   :  { %2982 = vmatprep.subr.bf16.mxu1 %v3225_v0 }
 0xa3a   :  { %2971 = vmatmul.mubr.msk.bf16.vlgmr.msra.gmra.mxu1 %vm1700_vm7, %v1796_v19 }
 0xa3b   :  { %v3145_v10 = vpop.eup %3144  ;;  %2986 = vmatprep.mubr.msk.bf16.mxu1 %vm3226_vm0, %v3225_v0 }
 0xa3c   :  { %v1778_v14 = vmul.f32 %v3145_v10, %v3692_v45 }
 0xa3e   :  { %v1791_v21 = vpack.c.bf16 %v1778_v14, %v1778_v14  ;;  %2549 = vst.msk [vmem:[#allocation6 + $0x10] sm:$0xff] %vm1700_vm7, %v1778_v14 }
 0xa3f   :  { %v3147_v22 = vpop.eup %3146 }
 0xa40   :  { %2953 = vmatmul.mubr.msk.bf16.vlgmr.msra.gmra.mxu0 %vm1700_vm7, %v1791_v21  ;;  %v1780_v24 = vmul.f32 %v3147_v22, %v3696_v41 }
 0xa41   :  { %2963 = vmatpush3.bf16.msra.mxu0 %v2092_v23  ;;  %2964 = vmatprep.mubr.msk.bf16.mxu0 %vm3226_vm0, %v3225_v0 }
 0xa42   :  { %2550 = vst.msk [vmem:[#allocation6 + $0x18] sm:$0xff] %vm1700_vm7, %v1780_v24  ;;  %2974 = vmatprep.subr.bf16.mxu0 %v3225_v0  ;;  %v1792_v25 = vpack.c.bf16 %v1780_v24, %v1780_v24 }
 0xa48   :  { %2965 = vmatmul.mubr.msk.bf16.vlgmr.msra.gmra.mxu0 %vm1700_vm7, %v1792_v25 }
 0xa49   :  { %2978 = vmatprep.mubr.msk.bf16.mxu0 %vm3226_vm0, %v3225_v0  ;;  %2975 = vmatpush3.bf16.msra.mxu0 %v2235_v51 }
 0xa4a   :  { %2976 = vmatprep.subr.bf16.mxu0 %v3225_v0 }
 0xa74   :  { %v1840_v26 = vpop.f32.mrf.mxu0 }
 0xa76   :  { %v2930_v27 = vpop.f32.mrf.mxu0 }
 0xa77   :  { %v1888_v30 = vpop.f32.mrf.mxu1 }
 0xa78   :  { %v1843_v31 = vpop.f32.mrf.mxu0 }
 0xa79   :  { %v2936_v32 = vpop.f32.mrf.mxu1 }
 0xa7a   :  { %v2931_v33 = vpop.f32.mrf.mxu0 }
 0xa7b   :  { %v1891_v34 = vpop.f32.mrf.mxu1 }
 0xa7d   :  { %v2937_v35 = vpop.f32.mrf.mxu1 }
 0xacb   :  { %v1936_v37 = vpop.f32.mrf.mxu0 }
 0xacd   :  { %v2942_v38 = vpop.f32.mrf.mxu0 }
 0xacf   :  { %v1939_v39 = vpop.f32.mrf.mxu0  ;;  %v1984_v43 = vpop.f32.mrf.mxu1 }
 0xad0   :  { %v3047_v40 = vpack.i.bf16 %v1984_v43, %v1936_v37 }
 0xad1   :  { %v2943_v45 = vpop.f32.mrf.mxu0  ;;  %v2948_v46 = vpop.f32.mrf.mxu1 }
 0xad2   :  { %3048 = vrot.lane.b32.xlu0 %v3047_v40, %s3238_s11  ;;  %v3070_v45 = vld [vmem:[#allocation2 + $0x8] sm:$0xff]   ;;  %v3072_v46 = vld [vmem:[%s3857_s5 + $0x38] sm:$0xff]  }
 0xad3   :  { %v1987_v47 = vpop.f32.mrf.mxu1  ;;  %2983 = vmatpush3.bf16.msra.mxu1 %v3070_v45 }
 0xad4   :  { %2984 = vmatprep.subr.bf16.mxu1 %v3225_v0  ;;  %v3073_v47 = vld [vmem:[%s3857_s5 + $0x30] sm:$0xff]  }
 0xad5   :  { %v2949_v48 = vpop.f32.mrf.mxu1 }
 0xad6   :  { %v3074_v48 = vld [vmem:[%s3857_s5 + $0x28] sm:$0xff]  }
 0xad7   :  { %v2080_v41 = vpop.f32.mrf.mxu1 }
 0xad9   :  { %v2960_v49 = vpop.f32.mrf.mxu1 }
 0xada   :  { %v3076_v49 = vld [vmem:[%s3857_s5 + $0x18] sm:$0xff]  }
 0xadb   :  { %v2083_v50 = vpop.f32.mrf.mxu1 }
 0xadd   :  { %v2961_v42 = vpop.f32.mrf.mxu1 }
 0xafa   :  { %v2176_v52 = vpop.f32.mrf.mxu1 }
 0xafc   :  { %v2972_v53 = vpop.f32.mrf.mxu1 }
 0xafe   :  { %v2179_v54 = vpop.f32.mrf.mxu1 }
 0xb00   :  { %v2032_v55 = vpop.f32.mrf.mxu0  ;;  %v2973_v56 = vpop.f32.mrf.mxu1 }
 0xb01   :  { %v3052_v58 = vpack.i.bf16 %v2080_v41, %v2032_v55  ;;  %v3075_v41 = vld [vmem:[%s3857_s5 + $0x20] sm:$0xff]  }
 0xb02   :  { %v2954_v59 = vpop.f32.mrf.mxu0 }
 0xb03   :  { %3053 = vrot.lane.b32.xlu1 %v3052_v58, %s3239_s12  ;;  %v2641_v58 = vld [vmem:[%s3858_s6 + $0x9] ss:$0 sm:$0xff] }
 0xb04   :  { %v2035_v60 = vpop.f32.mrf.mxu0 }
 0xb06   :  { %v2955_v61 = vpop.f32.mrf.mxu0 }
 0xb07   :  { %2232 = vrot.lane.b32.xlu1 %v3069_v3, %s3237_s10  ;;  %v2642_v61 = vld [vmem:[%s3858_s6 + $0xa] ss:$0 sm:$0xff] }
 0xb08   :  { %v2128_v4 = vpop.f32.mrf.mxu0 }
 0xb09   :  { %v3057_v62 = vpack.i.bf16 %v2176_v52, %v2128_v4 }
 0xb0a   :  { %v2966_v57 = vpop.f32.mrf.mxu0 }
 0xb0b   :  { %3058 = vrot.lane.b32.xlu0 %v3057_v62, %s3240_s14 }
 0xb0c   :  { %v2131_v63 = vpop.f32.mrf.mxu0 }
 0xb0e   :  { %v2967_v1 = vpop.f32.mrf.mxu0 }
 0xb0f   :  { %v3077_v1 = vld [vmem:[%s3857_s5 + $0x10] sm:$0xff]  }
 0xb44   :  { %v3049_v2 = vpop.permute.xlu0 %3048 }
 0xb45   :  { %v3051_v6 = vunpack.i.h.bf16 %v3049_v2  ;;  %v3050_v7 = vunpack.i.l.bf16 %v3049_v2  ;;  %v3079_v2 = vld [vmem:[%s3857_s5] sm:$0xff]  }
 0xb47   :  { %v2207_v12 = vsel %vm122_vm2, %v1888_v30, %v3051_v6  ;;  %v2206_v13 = vsel %vm122_vm2, %v1840_v26, %v3050_v7 }
 0xb75   :  { %v3054_v44 = vpop.permute.xlu1 %3053 }
 0xb76   :  { %v3056_v8 = vunpack.i.h.bf16 %v3054_v44  ;;  %v3055_v9 = vunpack.i.l.bf16 %v3054_v44  ;;  %v3078_v44 = vld [vmem:[%s3857_s5 + $0x8] sm:$0xff]   ;;  %s3241_s5 = smov [#allocation6]  }
 0xb77   :  { %s2572_s3 = sshll.u32 %s3241_s5, 4  ;;  %s2573_s3 = int_to_ptr.vmem [resolvable:$true] %s2572_s3 }
 0xb78   :  { %v2209_v17 = vsel %vm1033_vm4, %v2207_v12, %v3056_v8  ;;  %v2208_v18 = vsel %vm1033_vm4, %v2206_v13, %v3055_v9  ;;  %s3176_s24 = scalar_lea.vmem %s2573_s3, 1024  ;;  %p3181_p6 = scmp.lt.s32.totalorder %s2573_s3, %s2573_s3 }
 0xb79   :  { %v2233_v5 = vpop.permute.xlu1 %2232  ;;  %p3177_p5 = scmp.ne.s32.totalorder %s2573_s3, %s3176_s24  ;;  %p3182_p7 = scmp.lt.s32.totalorder %s3176_s24, %s3176_s24 }
 0xb7a   :  { %2977 = vmatpush3.bf16.msra.mxu0 %v2233_v5  ;;  %v2643_v5 = vld [vmem:[%s3858_s6 + $0x5] ss:$0 sm:$0xff] }
 0xb7b   :  { %2990 = vmatprep.subr.bf16.mxu0 %v3225_v0  ;;  %p3183_p8 = por %p3182_p7, %p3181_p6 }
 0xb7d   :  { %v3059_v11 = vpop.permute.xlu0 %3058  ;;  %p3184_p9 = pnand %p3183_p8, %p3177_p5 }
 0xb7e   :  { %v3061_v15 = vunpack.i.h.bf16 %v3059_v11  ;;  %v3060_v16 = vunpack.i.l.bf16 %v3059_v11 }
 0xb80   :  { %v2211_v19 = vsel %vm1036_vm5, %v2209_v17, %v3061_v15  ;;  %v2210_v10 = vsel %vm1036_vm5, %v2208_v18, %v3060_v16 }
 0xb81   :  { %v2216_v14 = vpack.c.bf16 %v2211_v19, %v2210_v10 }
 0xb83   :  { %2979 = vmatmul.mubr.msk.bf16.vlgmr.msra.gmra.mxu0 %vm72_vm1, %v2216_v14 }
 0xb84   :  { %3006 = vmatprep.mubr.msk.bf16.mxu0 %vm3226_vm0, %v3225_v0  ;;  %2991 = vmatpush3.bf16.msra.mxu0 %v3072_v46 }
 0xb85   :  { %2992 = vmatprep.subr.bf16.mxu0 %v3225_v0 }
 0xb88   :  { %2993 = vmatpush3.bf16.msra.mxu0 %v3073_v47 }
 0xb89   :  { %2994 = vmatprep.subr.bf16.mxu0 %v3225_v0 }
 0xb8c   :  { %2995 = vmatpush3.bf16.msra.mxu0 %v3074_v48 }
 0xb8d   :  { %2996 = vmatprep.subr.bf16.mxu0 %v3225_v0 }
 0xb90   :  { %2997 = vmatpush3.bf16.msra.mxu0 %v3075_v41 }
 0xb91   :  { %2998 = vmatprep.subr.bf16.mxu0 %v3225_v0 }
 0xb94   :  { %2999 = vmatpush3.bf16.msra.mxu0 %v3076_v49 }
 0xb95   :  { %3000 = vmatprep.subr.bf16.mxu0 %v3225_v0 }
 0xb98   :  { %3001 = vmatpush3.bf16.msra.mxu0 %v3077_v1 }
 0xb99   :  { %3002 = vmatprep.subr.bf16.mxu0 %v3225_v0 }
 0xb9c   :  { %3003 = vmatpush3.bf16.msra.mxu0 %v3078_v44 }
 0xb9d   :  { %3004 = vmatprep.subr.bf16.mxu0 %v3225_v0  ;;  %v2647_v0 = vld [vmem:[%s3858_s6 + $0x6] ss:$0 sm:$0xff] }
 0xba0   :  { %3005 = vmatpush3.bf16.msra.mxu0 %v3079_v2 }
 0xc43   :  { %v2275_v21 = vpop.f32.mrf.mxu0 }
 0xc44   :  { %v2276_v22 = vadd.f32 %v2637_v20, %v2275_v21 }
 0xc45   :  { %v2980_v23 = vpop.f32.mrf.mxu0 }
 0xc46   :  { %v2282_v24 = vadd.f32 %v2276_v22, %v3560_v28 }
 0xc47   :  { %v2278_v25 = vpop.f32.mrf.mxu0 }
 0xc48   :  { %v2279_v26 = vadd.f32 %v2637_v20, %v2278_v25  ;;  %v2286_v27 = vsel %vm72_vm1, %v2282_v24, 0.0 }
 0xc49   :  { %2287 = vadd.xlane.f32.xlu0 %v2286_v27  ;;  %v2981_v30 = vpop.f32.mrf.mxu0 }
 0xc4a   :  { %v2283_v31 = vadd.f32 %v2279_v26, %v3562_v29  ;;  %v3071_v29 = vld [vmem:[#allocation2] sm:$0xff]  }
 0xc4b   :  { %2985 = vmatpush3.bf16.msra.mxu1 %v3071_v29 }
 0xc4c   :  { %v2289_v32 = vsel %vm72_vm1, %v2283_v31, 0.0 }
 0xc4d   :  { %2290 = vadd.xlane.f32.xlu1 %v2289_v32 }
 0xcd2   :  { %v2288_v33 = vpop.xlane.xlu0 %2287 }
 0xcd3   :  { %v2292_v34 = vmul.f32 0.03125, %v2288_v33 }
 0xcd5   :  { %v2294_v35 = vsub.f32 %v2282_v24, %v2292_v34 }
 0xcd6   :  { %v2291_v36 = vpop.xlane.xlu1 %2290 }
 0xcd7   :  { %v2293_v37 = vmul.f32 0.03125, %v2291_v36  ;;  %v2296_v38 = vmul.f32 %v2294_v35, %v2294_v35 }
 0xcd9   :  { %v2295_v39 = vsub.f32 %v2283_v31, %v2293_v37  ;;  %v2298_v28 = vsel %vm72_vm1, %v2296_v38, 0.0 }
 0xcda   :  { %2299 = vadd.xlane.f32.xlu0 %v2298_v28 }
 0xcdb   :  { %v2297_v43 = vmul.f32 %v2295_v39, %v2295_v39 }
 0xcdd   :  { %v2301_v40 = vsel %vm72_vm1, %v2297_v43, 0.0 }
 0xcde   :  { %2302 = vadd.xlane.f32.xlu0 %v2301_v40 }
 0xd63   :  { %v2300_v50 = vpop.xlane.xlu0 %2299 }
 0xd64   :  { %v2304_v42 = vmul.f32 0.03125, %v2300_v50 }
 0xd66   :  { %v2306_v51 = vadd.f32 1e-05, %v2304_v42 }
 0xd67   :  { %v2303_v52 = vpop.xlane.xlu0 %2302 }
 0xd68   :  { %3148 = vrsqrt.f32 %v2306_v51  ;;  %v2305_v53 = vmul.f32 0.03125, %v2303_v52 }
 0xd6a   :  { %v2307_v54 = vadd.f32 1e-05, %v2305_v53 }
 0xd6c   :  { %3150 = vrsqrt.f32 %v2307_v54 }
 0xd75   :  { %v3149_v55 = vpop.eup %3148 }
 0xd76   :  { %v2310_v56 = vmul.f32 %v3149_v55, %v2294_v35 }
 0xd78   :  { %v2316_v60 = vmul.f32 %v2641_v58, %v2310_v56 }
 0xd79   :  { %v3151_v59 = vpop.eup %3150 }
 0xd7a   :  { %v2311_v3 = vmul.f32 %v3151_v59, %v2295_v39  ;;  %v2322_v62 = vadd.f32 %v2642_v61, %v2316_v60 }
 0xd7c   :  { %v2317_v4 = vmul.f32 %v2641_v58, %v2311_v3 }
 0xd7e   :  { %v2323_v57 = vadd.f32 %v2642_v61, %v2317_v4 }
 0xd80   :  { %v2328_v63 = vpack.c.bf16 %v2323_v57, %v2322_v62 }
 0xd82   :  { %2987 = vmatmul.mubr.msk.bf16.vlgmr.msra.gmra.mxu1 %vm72_vm1, %v2328_v63 }
 0xe42   :  { %v2383_v6 = vpop.f32.mrf.mxu1 }
 0xe43   :  { %v2384_v8 = vadd.f32 %v2643_v5, %v2383_v6 }
 0xe44   :  { %v2988_v7 = vpop.f32.mrf.mxu1 }
 0xe45   :  { %v2390_v13 = vmax.f32 %v2384_v8, 0.0 }
 0xe46   :  { %v2386_v9 = vpop.f32.mrf.mxu1 }
 0xe47   :  { %v2387_v11 = vadd.f32 %v2643_v5, %v2386_v9 }
 0xe48   :  { %v2989_v12 = vpop.f32.mrf.mxu1 }
 0xe49   :  { %v2391_v15 = vmax.f32 %v2387_v11, 0.0 }
 0xe4b   :  { %v2408_v16 = vpack.c.bf16 %v2391_v15, %v2390_v13 }
 0xe4d   :  { %3007 = vmatmul.mubr.bf16.vlgmr.msra.gmra.mxu0 %v2408_v16 }
 0xf0d   :  { %v2496_v17 = vpop.f32.mrf.mxu0 }
 0xf0e   :  { %v2497_v18 = vadd.f32 %v2647_v0, %v2496_v17 }
 0xf0f   :  { %v3008_v19 = vpop.f32.mrf.mxu0 }
 0xf10   :  { %v2503_v10 = vadd.f32 %v2497_v18, %v2322_v62 }
 0xf11   :  { %v2499_v14 = vpop.f32.mrf.mxu0 }
 0xf12   :  { %v2500_v20 = vadd.f32 %v2647_v0, %v2499_v14  ;;  %v2507_v21 = vsel %vm72_vm1, %v2503_v10, 0.0 }
 0xf13   :  { %2508 = vadd.xlane.f32.xlu1 %v2507_v21  ;;  %v3009_v22 = vpop.f32.mrf.mxu0 }
 0xf14   :  { %v2504_v23 = vadd.f32 %v2500_v20, %v2323_v57 }
 0xf16   :  { %v2510_v24 = vsel %vm72_vm1, %v2504_v23, 0.0 }
 0xf17   :  { %2511 = vadd.xlane.f32.xlu0 %v2510_v24 }
 0xf9c   :  { %v2509_v25 = vpop.xlane.xlu1 %2508 }
 0xf9d   :  { %v2513_v26 = vmul.f32 0.03125, %v2509_v25 }
 0xf9f   :  { %v2515_v27 = vsub.f32 %v2503_v10, %v2513_v26 }
 0xfa0   :  { %v2512_v30 = vpop.xlane.xlu0 %2511 }
 0xfa1   :  { %v2514_v31 = vmul.f32 0.03125, %v2512_v30  ;;  %v2517_v32 = vmul.f32 %v2515_v27, %v2515_v27 }
 0xfa3   :  { %v2516_v33 = vsub.f32 %v2504_v23, %v2514_v31  ;;  %v2519_v34 = vsel %vm72_vm1, %v2517_v32, 0.0 }
 0xfa4   :  { %2520 = vadd.xlane.f32.xlu1 %v2519_v34 }
 0xfa5   :  { %v2518_v35 = vmul.f32 %v2516_v33, %v2516_v33 }
 0xfa7   :  { %v2522_v36 = vsel %vm72_vm1, %v2518_v35, 0.0 }
 0xfa8   :  { %2523 = vadd.xlane.f32.xlu0 %v2522_v36 }
 0xfa9   :  { %3187 = shalt.err (!%p3184_p9)
}
 0xfaa   :  { %s3242_s25 = smov 128   ;;  %v2656_v29 = vld [vmem:[%s3858_s6 + $0xb] ss:$0 sm:$0xff]  ;;  %v2657_v47 = vld [vmem:[%s3858_s6 + $0xc] ss:$0 sm:$0xff] }
 0xfab   :  { %2578 = dma.vmem_to_hbm [thread:$0]  %s2573_s3, 1024, %s3860_s8, [#allocation7], %s3242_s25, %s3242_s25, %s3238_s11  }
 0xfac   :  { %s3243_s8 = smov [#allocation5]  }
 0xfad   :  { %s2560_s27 = sshll.u32 %s3243_s8, 4  ;;  %s2561_s27 = int_to_ptr.vmem [resolvable:$true] %s2560_s27 }
 0xfae   :  { %s3196_s28 = scalar_lea.vmem %s2561_s27, 256  ;;  %p3201_p11 = scmp.lt.s32.totalorder %s2561_s27, %s2561_s27 }
 0xfaf   :  { %p3197_p10 = scmp.ne.s32.totalorder %s2561_s27, %s3196_s28  ;;  %p3202_p12 = scmp.lt.s32.totalorder %s3196_s28, %s3196_s28 }
 0xfb1   :  { %p3203_p13 = por %p3202_p12, %p3201_p11 }
 0xfb3   :  { %p3204_p0 = pnand %p3203_p13, %p3197_p10 }
0x102d   :  { %v2521_v37 = vpop.xlane.xlu1 %2520 }
0x102e   :  { %v2525_v38 = vmul.f32 0.03125, %v2521_v37 }
0x1030   :  { %v2527_v39 = vadd.f32 1e-05, %v2525_v38 }
0x1031   :  { %v2524_v28 = vpop.xlane.xlu0 %2523 }
0x1032   :  { %3152 = vrsqrt.f32 %v2527_v39  ;;  %v2526_v43 = vmul.f32 0.03125, %v2524_v28 }
0x1034   :  { %v2528_v40 = vadd.f32 1e-05, %v2526_v43 }
0x1036   :  { %3154 = vrsqrt.f32 %v2528_v40 }
0x103f   :  { %v3153_v45 = vpop.eup %3152 }
0x1040   :  { %v2531_v46 = vmul.f32 %v3153_v45, %v2515_v27 }
0x1042   :  { %v2537_v48 = vmul.f32 %v2656_v29, %v2531_v46 }
0x1043   :  { %v3155_v41 = vpop.eup %3154 }
0x1044   :  { %v2532_v49 = vmul.f32 %v3155_v41, %v2516_v33  ;;  %v2543_v50 = vadd.f32 %v2657_v47, %v2537_v48 }
0x1046   :  { %v2538_v42 = vmul.f32 %v2656_v29, %v2532_v49  ;;  %2545 = vst.msk [vmem:[#allocation5] sm:$0xff] %vm72_vm1, %v2543_v50 }
0x1048   :  { %v2544_v51 = vadd.f32 %v2657_v47, %v2538_v42 }
0x104a   :  { %2546 = vst.msk [vmem:[#allocation5 + $0x8] sm:$0xff] %vm72_vm1, %v2544_v51 }
0x104b   :  { %3207 = shalt.err (!%p3204_p0)
}
0x104c   :  { %2566 = dma.vmem_to_hbm [thread:$0]  %s2561_s27, 256, %s3859_s7, [#allocation4], %s3242_s25, %s3242_s25, %s3238_s11  }
0x104d   :  { %3218 = dma.done.wait [#allocation4], 256  }
0x104e   :  { %3219 = vsyncadd [#allocation4], 4294967040 }
0x104f   :  { %3220 = dma.done.wait [#allocation7], 1024  }
0x1050   :  { %3221 = vsyncadd [#allocation7], 4294966272 }
0x1051   :  { %2585 = vsyncpa [#allocation3], 1 }
0x1052   :  { %2586 = vsyncpa [#allocation4], 1 }
0x1053   :  { %2587 = vsyncpa [#allocation7], 1 }

</bundles_post_ra>
